<compile_context>
chip_gen: v6e
topology: v6e:2x2x1
jax: 0.10.0
libtpu: 0.0.40
codegen_flags: <defaults>
</compile_context>

<pallas_src>
import functools

import jax
import jax.numpy as jnp
from jax.experimental import pallas as pl
from jax.experimental.pallas import tpu as pltpu


def _midblock_kernel(xw_ref, audio_ref, audio_t_ref, w1_ref, wq_ref, wk_ref,
                     wv_ref, w2_ref, consts_ref, mask_ref, out_ref, zext_ref,
                     *, row_stride, interior, fuse_taps):
    f32, bf16 = jnp.float32, jnp.bfloat16
    cp, npad = out_ref.shape[1], out_ref.shape[2]

    consts = consts_ref[...]                      # (Cp, 8) f32 packed constants
    b1, bq = consts[:, 0:1], consts[:, 1:2]
    bn2s, bn2b = consts[:, 2:3], consts[:, 3:4]
    b2 = consts[:, 4:5]
    mask = mask_ref[...]                          # (1, Npad): 1.0 on real pixels

    # Persistent zero-extended slab: [ zeros(LO) | interior(Npad) | zeros ].
    # Borders are re-zeroed every step (cheap; safe under megacore sharding).
    zext_ref[:, :interior] = jnp.zeros((cp, interior), f32)
    hi = zext_ref.shape[1] - interior - npad
    zext_ref[:, interior + npad:] = jnp.zeros((cp, hi), f32)

    def conv3x3(w_ref_, bias):
        # 3x3 'SAME' conv via 9 lane-shifted reads of the zext slab; top/bottom/
        # left/right padding falls into the zero borders / zero pad columns.
        if fuse_taps:
            # Tiny Cp: one fused im2col matmul (K = 9*Cp) fills the MXU better.
            taps = []
            for dy in range(3):
                for dx in range(3):
                    start = interior + (dy - 1) * row_stride + (dx - 1)
                    taps.append(zext_ref[:, pl.ds(start, npad)])
            patches = jnp.concatenate(taps, axis=0).astype(bf16)    # (9Cp, Npad)
            out = jnp.dot(w_ref_[...], patches, preferred_element_type=f32)
        else:
            # Large Cp: per-tap accumulation -> no (9Cp, Npad) patch matrix,
            # live VMEM stays ~1 slab, accumulation lands in f32 / MRB.
            out = None
            tap_idx = 0
            for dy in range(3):
                for dx in range(3):
                    start = interior + (dy - 1) * row_stride + (dx - 1)
                    tap = zext_ref[:, pl.ds(start, npad)].astype(bf16)
                    part = jnp.dot(w_ref_[:, tap_idx * cp:(tap_idx + 1) * cp],
                                   tap, preferred_element_type=f32)
                    out = part if out is None else out + part
                    tap_idx += 1
        return out + bias

    # ---- conv1 (BN1 pre-folded into weight/bias) + SiLU ----
    zext_ref[:, pl.ds(interior, npad)] = xw_ref[0].astype(f32)
    h = conv3x3(w1_ref, b1)
    h = h * jax.nn.sigmoid(h)                                        # (Cp, Npad)

    # ---- cross attention, channels-first (1/sqrt(C) folded into W_Q/b_Q;
    #      K/V biases folded into weights via the audio "ones" column) ----
    q = jnp.dot(wq_ref[...], h.astype(bf16), preferred_element_type=f32) + bq   # (Cp, N)
    k = jnp.dot(audio_ref[0], wk_ref[...], preferred_element_type=f32)          # (S, Cp)
    vt = jnp.dot(wv_ref[...], audio_t_ref[0], preferred_element_type=f32)       # (Cp, S)
    s = jnp.dot(k.astype(bf16), q.astype(bf16), preferred_element_type=f32)     # (S, N)
    s = s - jnp.max(s, axis=0, keepdims=True)
    e = jnp.exp(s)
    attn = e / jnp.sum(e, axis=0, keepdims=True)                     # exact softmax
    h2 = jnp.dot(vt.astype(bf16), attn.astype(bf16), preferred_element_type=f32)

    # ---- BN2 (eval affine). Re-zero pad columns AFTER the shift so conv2
    # sees true zero padding. ----
    h2 = (h2 * bn2s + bn2b) * mask

    # ---- conv2 + SiLU; Dropout2d is identity in eval mode ----
    zext_ref[:, pl.ds(interior, npad)] = h2
    o = conv3x3(w2_ref, b2)
    out_ref[...] = (o * jax.nn.sigmoid(o))[None]


def _fold_bn(gamma, beta, mean, var, eps=1e-5):
    scale = gamma / jnp.sqrt(var + eps)
    shift = beta - mean * scale
    return scale, shift


def midblock_forward(x_nchw, t, audio_embed, params):
    """x: (B,C,H,W) f32, audio_embed: (B,S,Da) f32 -> (B,C,H,W) f32."""
    del t  # `t` is unused by MidBlock.forward
    f32, bf16 = jnp.float32, jnp.bfloat16
    B, C, H, W = x_nchw.shape
    S, Da = audio_embed.shape[1], audio_embed.shape[2]
    Da1 = Da + 1
    Cp = ((C + 7) // 8) * 8                 # pad channels to the f32 sublane tile

    # Row stride >= W+2 (right-hand conv padding).  Try to make H*Wp a multiple
    # of 128 by widening it slightly, else pad the tail -> lane-dense stores.
    Wp = W + 2
    for cand in range(W + 2, W + 11):
        if (H * cand) % 128 == 0:
            Wp = cand
            break
    Nv = H * Wp                              # flattened extent incl. row padding
    Npad = ((Nv + 127) // 128) * 128         # lane-dense slab width
    LO = ((Wp + 1 + 127) // 128) * 128       # aligned start of the slab interior
    zext_w = LO + Npad + Wp + 1
    fuse_taps = Cp < 128

    def padc(a, axes):
        pads = [(0, 0)] * a.ndim
        for ax in axes:
            pads[ax] = (0, Cp - a.shape[ax])
        return jnp.pad(a, pads)

    # ---- activations ----
    x = x_nchw.astype(f32)
    xw = jnp.pad(x, ((0, 0), (0, Cp - C), (0, 0), (0, Wp - W))).reshape(B, Cp, Nv)
    xw = jnp.pad(xw, ((0, 0), (0, 0), (0, Npad - Nv))).astype(bf16)
    ones = jnp.ones((B, S, 1), f32)
    audio_aug = jnp.concatenate([audio_embed.astype(f32), ones], axis=2).astype(bf16)
    audio_t_aug = jnp.transpose(audio_aug, (0, 2, 1))                 # (B, Da+1, S)

    # ---- constants (folded in f32, matmul weights stored as bf16) ----
    scale1, shift1 = _fold_bn(*params["bn1"])
    scale2, shift2 = _fold_bn(*params["bn2"])
    scale1, shift1 = padc(scale1, (0,)), padc(shift1, (0,))
    scale2, shift2 = padc(scale2, (0,)), padc(shift2, (0,))

    def im2col_w(w_hwio, out_scale=None):
        # (3,3,Cin,Cout) -> (Cp, 9*Cp); column index = (ky*3 + kx)*Cp + ci.
        w = padc(w_hwio.astype(f32), (2, 3))
        w = jnp.transpose(w, (3, 0, 1, 2)).reshape(Cp, 9 * Cp)
        if out_scale is not None:
            w = w * out_scale[:, None]
        return w.astype(bf16)

    w1f = im2col_w(params["conv1_w"], scale1)                         # BN1 folded
    b1f = padc(params["conv1_b"], (0,)) * scale1 + shift1
    w2f = im2col_w(params["conv2_w"])
    b2f = padc(params["conv2_b"], (0,))

    inv_sqrt_c = 1.0 / float(C) ** 0.5                                # attn scale
    wqT = (padc(params["wq"].astype(f32), (0, 1)) * inv_sqrt_c).T.astype(bf16)
    bqf = padc(params["bq"], (0,)) * inv_sqrt_c
    wk_aug = jnp.concatenate([padc(params["wk"].astype(f32), (1,)),
                              padc(params["bk"], (0,))[None, :]], axis=0).astype(bf16)
    wvT_aug = jnp.concatenate([padc(params["wv"].astype(f32), (1,)),
                               padc(params["bv"], (0,))[None, :]], axis=0).T.astype(bf16)

    zcol = jnp.zeros((Cp,), f32)
    consts = jnp.stack([b1f, bqf, scale2, shift2, b2f, zcol, zcol, zcol], axis=1)

    idx = jnp.arange(Npad)
    colmask = ((idx % Wp < W) & (idx < Nv)).astype(f32).reshape(1, Npad)

    # ---- specs ----
    def const_spec(shape):
        # Grid-constant blocks: single buffer is enough (saves VMEM at large Cp).
        return pl.BlockSpec(shape, lambda b: (0, 0), pipeline_mode=pl.Buffered(1))

    in_specs = [
        pl.BlockSpec((1, Cp, Npad), lambda b: (b, 0, 0)),   # x slab (bf16)
        pl.BlockSpec((1, S, Da1), lambda b: (b, 0, 0)),     # [audio | 1]
        pl.BlockSpec((1, Da1, S), lambda b: (b, 0, 0)),     # [audio | 1]^T
        const_spec((Cp, 9 * Cp)),   # conv1 weight (im2col, BN1 folded)
        const_spec((Cp, Cp)),       # W_Q^T / sqrt(C)
        const_spec((Da1, Cp)),      # [W_K ; b_K]
        const_spec((Cp, Da1)),      # [W_V ; b_V]^T
        const_spec((Cp, 9 * Cp)),   # conv2 weight (im2col)
        const_spec((Cp, 8)),        # packed per-channel constants
        const_spec((1, Npad)),      # valid-column mask
    ]

    # Scoped-VMEM limit derived from the actual block sizes (with headroom),
    # capped below v7x's 64 MiB physical VMEM.
    est = (2 * Cp * Npad * (2 + 4)                               # x (bf16) + out (f32), 2x buffered
           + 2 * 2 * 2 * S * Da1                                 # audio / audio^T
           + (2 * 9 * Cp * Cp + Cp * Cp + 2 * Da1 * Cp) * 2      # bf16 weights (1x buffered)
           + (Cp * 8 + Npad) * 4                                 # consts + mask
           + Cp * zext_w * 4)                                    # zext scratch
    vmem_limit = int(min(64 * 2 ** 20, max(4 * est, 16 * 2 ** 20)))

    out_flat = pl.pallas_call(
        functools.partial(_midblock_kernel, row_stride=Wp, interior=LO,
                          fuse_taps=fuse_taps),
        out_shape=jax.ShapeDtypeStruct((B, Cp, Npad), f32),
        grid_spec=pltpu.PrefetchScalarGridSpec(
            num_scalar_prefetch=0,
            grid=(B,),
            in_specs=in_specs,
            out_specs=pl.BlockSpec((1, Cp, Npad), lambda b: (b, 0, 0)),
            scratch_shapes=[pltpu.VMEM((Cp, zext_w), f32)],
        ),
        # Batch elements are independent: "parallel" lets v7x shard the batch
        # axis across its 2 TensorCores; no cost on v5e/v6e.
        compiler_params=pltpu.CompilerParams(
            dimension_semantics=("parallel",),
            vmem_limit_bytes=vmem_limit),
    )(xw, audio_aug, audio_t_aug, w1f, wqT, wk_aug, wvT_aug, w2f, consts, colmask)

    # Drop padded channels / pad columns; result is already NCHW (no transposes).
    return out_flat[:, :C, :Nv].reshape(B, C, H, Wp)[:, :, :, :W]


def midblock_ref(x, audio, params):
    """Pure-JAX f32 reference (same eval-mode semantics) for verification."""
    eps = 1e-5
    rs = lambda a: a[None, :, None, None]

    def bn(h, stats):
        g, b, m, v = stats
        return (h - rs(m)) / jnp.sqrt(rs(v) + eps) * rs(g) + rs(b)

    h = jax.lax.conv_general_dilated(
        x, params["conv1_w"], (1, 1), "SAME",
        dimension_numbers=("NCHW", "HWIO", "NCHW")) + rs(params["conv1_b"])
    h = bn(h, params["bn1"])
    h = h * jax.nn.sigmoid(h)

    B, C, H, W = h.shape
    hf = jnp.transpose(h.reshape(B, C, H * W), (0, 2, 1))       # (B, HW, C)
    Q = hf @ params["wq"] + params["bq"]
    K = audio @ params["wk"] + params["bk"]
    V = audio @ params["wv"] + params["bv"]
    scores = jnp.einsum("bqc,bkc->bqk", Q, K) / (C ** 0.5)
    attn = jax.nn.softmax(scores, axis=-1)
    h2 = jnp.einsum("bqk,bkc->bqc", attn, V)
    h2 = jnp.transpose(h2, (0, 2, 1)).reshape(B, C, H, W)

    h2 = bn(h2, params["bn2"])
    h2 = jax.lax.conv_general_dilated(
        h2, params["conv2_w"], (1, 1), "SAME",
        dimension_numbers=("NCHW", "HWIO", "NCHW")) + rs(params["conv2_b"])
    return h2 * jax.nn.sigmoid(h2)


if __name__ == "__main__":
    B, C, H, W = 2, 4, 16, 16   # dim = 4
    S, Da = 8, 32               # seq_len = 8, audio_ctx_dim = 32

    key = jax.random.PRNGKey(0)
    ks = jax.random.split(key, 18)

    params = {
        "conv1_w": 0.1 * jax.random.normal(ks[0], (3, 3, C, C), jnp.float32),
        "conv1_b": 0.1 * jax.random.normal(ks[1], (C,), jnp.float32),
        "bn1": (jnp.ones((C,), jnp.float32) + 0.1 * jax.random.normal(ks[2], (C,)),
                0.1 * jax.random.normal(ks[3], (C,)),
                jnp.zeros((C,), jnp.float32),       # running_mean
                jnp.ones((C,), jnp.float32)),       # running_var
        "wq": 0.2 * jax.random.normal(ks[4], (C, C), jnp.float32),
        "bq": 0.1 * jax.random.normal(ks[5], (C,), jnp.float32),
        "wk": 0.2 * jax.random.normal(ks[6], (Da, C), jnp.float32),
        "bk": 0.1 * jax.random.normal(ks[7], (C,), jnp.float32),
        "wv": 0.2 * jax.random.normal(ks[8], (Da, C), jnp.float32),
        "bv": 0.1 * jax.random.normal(ks[9], (C,), jnp.float32),
        "bn2": (jnp.ones((C,), jnp.float32) + 0.1 * jax.random.normal(ks[10], (C,)),
                0.1 * jax.random.normal(ks[11], (C,)),
                jnp.zeros((C,), jnp.float32),
                jnp.ones((C,), jnp.float32)),
        "conv2_w": 0.1 * jax.random.normal(ks[12], (3, 3, C, C), jnp.float32),
        "conv2_b": 0.1 * jax.random.normal(ks[13], (C,), jnp.float32),
    }

    x = jax.random.normal(ks[14], (B, C, H, W), jnp.float32)
    audio = jax.random.normal(ks[15], (B, S, Da), jnp.float32)
    t = jnp.zeros((B,), jnp.float32)  # unused by the forward pass

    out = jax.jit(midblock_forward)(x, t, audio, params)
    out = jax.block_until_ready(out)

    ref = midblock_ref(x, audio, params)
    assert out.shape == (B, C, H, W), out.shape
    # bf16 matmul operands (f32 accumulation) -> slightly looser tolerance vs
    # the full-f32 reference.
    assert jnp.allclose(out, ref, atol=3e-2, rtol=3e-2), \
        f"max abs diff {jnp.max(jnp.abs(out - ref))}"

    print("KERNEL_OK")
</pallas_src>

<mosaic_0001>
module attributes {stable_mosaic.version = 11 : i64} {
  func.func @_midblock_kernel(%arg0: i32, %arg1: memref<1x8x384xbf16, #tpu.memory_space<vmem>>, %arg2: memref<1x8x33xbf16, #tpu.memory_space<vmem>>, %arg3: memref<1x33x8xbf16, #tpu.memory_space<vmem>>, %arg4: memref<8x72xbf16, #tpu.memory_space<vmem>>, %arg5: memref<8x8xbf16, #tpu.memory_space<vmem>>, %arg6: memref<33x8xbf16, #tpu.memory_space<vmem>>, %arg7: memref<8x33xbf16, #tpu.memory_space<vmem>>, %arg8: memref<8x72xbf16, #tpu.memory_space<vmem>>, %arg9: memref<8x8xf32, #tpu.memory_space<vmem>>, %arg10: memref<1x384xf32, #tpu.memory_space<vmem>>, %arg11: memref<1x8x384xf32, #tpu.memory_space<vmem>>, %arg12: memref<8x537xf32, #tpu.memory_space<vmem>>) attributes {dimension_semantics = [#tpu.dimension_semantics<parallel>], iteration_bounds = array<i64: 2>, scalar_prefetch = 0 : i64, scratch_operands = 1 : i64, tpu.core_type = #tpu.core_type<tc>, window_params = [{transform_indices = @transform_0, window_bounds = array<i64: 1, 8, 384>}, {transform_indices = @transform_1, window_bounds = array<i64: 1, 8, 33>}, {transform_indices = @transform_2, window_bounds = array<i64: 1, 33, 8>}, {pipeline_mode = #tpu.pipeline_mode<synchronous>, transform_indices = @transform_3, window_bounds = array<i64: 8, 72>}, {pipeline_mode = #tpu.pipeline_mode<synchronous>, transform_indices = @transform_4, window_bounds = array<i64: 8, 8>}, {pipeline_mode = #tpu.pipeline_mode<synchronous>, transform_indices = @transform_5, window_bounds = array<i64: 33, 8>}, {pipeline_mode = #tpu.pipeline_mode<synchronous>, transform_indices = @transform_6, window_bounds = array<i64: 8, 33>}, {pipeline_mode = #tpu.pipeline_mode<synchronous>, transform_indices = @transform_7, window_bounds = array<i64: 8, 72>}, {pipeline_mode = #tpu.pipeline_mode<synchronous>, transform_indices = @transform_8, window_bounds = array<i64: 8, 8>}, {pipeline_mode = #tpu.pipeline_mode<synchronous>, transform_indices = @transform_9, window_bounds = array<i64: 1, 384>}, {transform_indices = @transform_10, window_bounds = array<i64: 1, 8, 384>}]} {
    %c0 = arith.constant 0 : index
    %c0_0 = arith.constant 0 : index
    %0 = vector.load %arg9[%c0, %c0_0] : memref<8x8xf32, #tpu.memory_space<vmem>>, vector<8x8xf32>
    %1 = vector.extract_strided_slice %0 {offsets = [0, 0], sizes = [8, 1], strides = [1, 1]} : vector<8x8xf32> to vector<8x1xf32>
    %2 = vector.extract_strided_slice %0 {offsets = [0, 1], sizes = [8, 1], strides = [1, 1]} : vector<8x8xf32> to vector<8x1xf32>
    %3 = vector.extract_strided_slice %0 {offsets = [0, 2], sizes = [8, 1], strides = [1, 1]} : vector<8x8xf32> to vector<8x1xf32>
    %4 = vector.extract_strided_slice %0 {offsets = [0, 3], sizes = [8, 1], strides = [1, 1]} : vector<8x8xf32> to vector<8x1xf32>
    %5 = vector.extract_strided_slice %0 {offsets = [0, 4], sizes = [8, 1], strides = [1, 1]} : vector<8x8xf32> to vector<8x1xf32>
    %c0_1 = arith.constant 0 : index
    %c0_2 = arith.constant 0 : index
    %6 = vector.load %arg10[%c0_1, %c0_2] : memref<1x384xf32, #tpu.memory_space<vmem>>, vector<1x384xf32>
    %cst = arith.constant 0.000000e+00 : f32
    %7 = vector.broadcast %cst : f32 to vector<8x128xf32>
    %c0_3 = arith.constant 0 : index
    %c0_4 = arith.constant 0 : index
    %8 = vector.load %arg12[%c0_3, %c0_4] : memref<8x537xf32, #tpu.memory_space<vmem>>, vector<8x128xf32>
    tpu.vector_store %arg12[%c0_3, %c0_4], %7 {strides = array<i32>} : memref<8x537xf32, #tpu.memory_space<vmem>>, vector<8x128xf32>,
    %cst_5 = arith.constant 0.000000e+00 : f32
    %9 = vector.broadcast %cst_5 : f32 to vector<8x25xf32>
    %c0_6 = arith.constant 0 : index
    %c512 = arith.constant 512 : index
    %10 = vector.load %arg12[%c0_6, %c512] : memref<8x537xf32, #tpu.memory_space<vmem>>, vector<8x25xf32>
    tpu.vector_store %arg12[%c0_6, %c512], %9 {strides = array<i32>} : memref<8x537xf32, #tpu.memory_space<vmem>>, vector<8x25xf32>,
    %c0_7 = arith.constant 0 : index
    %c0_8 = arith.constant 0 : index
    %c0_9 = arith.constant 0 : index
    %11 = vector.load %arg1[%c0_7, %c0_8, %c0_9] : memref<1x8x384xbf16, #tpu.memory_space<vmem>>, vector<1x8x384xbf16>
    %12 = vector.shape_cast %11 : vector<1x8x384xbf16> to vector<8x384xbf16>
    %13 = arith.extf %12 : vector<8x384xbf16> to vector<8x384xf32>
    %c0_10 = arith.constant 0 : index
    %c128 = arith.constant 128 : index
    %14 = vector.load %arg12[%c0_10, %c128] : memref<8x537xf32, #tpu.memory_space<vmem>>, vector<8x384xf32>
    tpu.vector_store %arg12[%c0_10, %c128], %13 {strides = array<i32>} : memref<8x537xf32, #tpu.memory_space<vmem>>, vector<8x384xf32>,
    %c0_11 = arith.constant 0 : index
    %c103 = arith.constant 103 : index
    %15 = vector.load %arg12[%c0_11, %c103] : memref<8x537xf32, #tpu.memory_space<vmem>>, vector<8x384xf32>
    %c0_12 = arith.constant 0 : index
    %c104 = arith.constant 104 : index
    %16 = vector.load %arg12[%c0_12, %c104] : memref<8x537xf32, #tpu.memory_space<vmem>>, vector<8x384xf32>
    %c0_13 = arith.constant 0 : index
    %c105 = arith.constant 105 : index
    %17 = vector.load %arg12[%c0_13, %c105] : memref<8x537xf32, #tpu.memory_space<vmem>>, vector<8x384xf32>
    %c0_14 = arith.constant 0 : index
    %c127 = arith.constant 127 : index
    %18 = vector.load %arg12[%c0_14, %c127] : memref<8x537xf32, #tpu.memory_space<vmem>>, vector<8x384xf32>
    %c0_15 = arith.constant 0 : index
    %c128_16 = arith.constant 128 : index
    %19 = vector.load %arg12[%c0_15, %c128_16] : memref<8x537xf32, #tpu.memory_space<vmem>>, vector<8x384xf32>
    %c0_17 = arith.constant 0 : index
    %c129 = arith.constant 129 : index
    %20 = vector.load %arg12[%c0_17, %c129] : memref<8x537xf32, #tpu.memory_space<vmem>>, vector<8x384xf32>
    %c0_18 = arith.constant 0 : index
    %c151 = arith.constant 151 : index
    %21 = vector.load %arg12[%c0_18, %c151] : memref<8x537xf32, #tpu.memory_space<vmem>>, vector<8x384xf32>
    %c0_19 = arith.constant 0 : index
    %c152 = arith.constant 152 : index
    %22 = vector.load %arg12[%c0_19, %c152] : memref<8x537xf32, #tpu.memory_space<vmem>>, vector<8x384xf32>
    %c0_20 = arith.constant 0 : index
    %c153 = arith.constant 153 : index
    %23 = vector.load %arg12[%c0_20, %c153] : memref<8x537xf32, #tpu.memory_space<vmem>>, vector<8x384xf32>
    %24 = tpu.concatenate %15, %16, %17, %18, %19, %20, %21, %22, %23 in 0 : vector<8x384xf32>, vector<8x384xf32>, vector<8x384xf32>, vector<8x384xf32>, vector<8x384xf32>, vector<8x384xf32>, vector<8x384xf32>, vector<8x384xf32>, vector<8x384xf32> -> vector<72x384xf32>
    %25 = arith.truncf %24 : vector<72x384xf32> to vector<72x384xbf16>
    %c0_21 = arith.constant 0 : index
    %c0_22 = arith.constant 0 : index
    %26 = vector.load %arg4[%c0_21, %c0_22] : memref<8x72xbf16, #tpu.memory_space<vmem>>, vector<8x72xbf16>
    %cst_23 = arith.constant dense<0.000000e+00> : vector<8x384xf32>
    %27 = tpu.matmul %26, %25, %cst_23 {dimension_numbers = #tpu.dot_dimension_numbers<[1], [0], [0], [1], [0, 0, 1, 1], [], []>} : vector<8x72xbf16>, vector<72x384xbf16>, vector<8x384xf32> -> vector<8x384xf32>
    %28 = vector.broadcast %1 : vector<8x1xf32> to vector<8x384xf32>
    %29 = arith.addf %27, %28 : vector<8x384xf32>
    %30 = arith.negf %29 : vector<8x384xf32>
    %31 = math.exp %30 : vector<8x384xf32>
    %cst_24 = arith.constant 1.000000e+00 : f32
    %32 = vector.broadcast %cst_24 : f32 to vector<8x384xf32>
    %33 = arith.addf %32, %31 : vector<8x384xf32>
    %34 = arith.divf %32, %33 : vector<8x384xf32>
    %35 = arith.mulf %29, %34 : vector<8x384xf32>
    %c0_25 = arith.constant 0 : index
    %c0_26 = arith.constant 0 : index
    %36 = vector.load %arg5[%c0_25, %c0_26] : memref<8x8xbf16, #tpu.memory_space<vmem>>, vector<8x8xbf16>
    %37 = arith.truncf %35 : vector<8x384xf32> to vector<8x384xbf16>
    %cst_27 = arith.constant dense<0.000000e+00> : vector<8x384xf32>
    %38 = tpu.matmul %36, %37, %cst_27 {dimension_numbers = #tpu.dot_dimension_numbers<[1], [0], [0], [1], [0, 0, 1, 1], [], []>} : vector<8x8xbf16>, vector<8x384xbf16>, vector<8x384xf32> -> vector<8x384xf32>
    %39 = vector.broadcast %2 : vector<8x1xf32> to vector<8x384xf32>
    %40 = arith.addf %38, %39 : vector<8x384xf32>
    %c0_28 = arith.constant 0 : index
    %c0_29 = arith.constant 0 : index
    %c0_30 = arith.constant 0 : index
    %41 = vector.load %arg2[%c0_28, %c0_29, %c0_30] : memref<1x8x33xbf16, #tpu.memory_space<vmem>>, vector<1x8x33xbf16>
    %42 = vector.shape_cast %41 : vector<1x8x33xbf16> to vector<8x33xbf16>
    %c0_31 = arith.constant 0 : index
    %c0_32 = arith.constant 0 : index
    %43 = vector.load %arg6[%c0_31, %c0_32] : memref<33x8xbf16, #tpu.memory_space<vmem>>, vector<33x8xbf16>
    %cst_33 = arith.constant dense<0.000000e+00> : vector<8x8xf32>
    %44 = tpu.matmul %42, %43, %cst_33 {dimension_numbers = #tpu.dot_dimension_numbers<[1], [0], [0], [1], [0, 0, 1, 1], [], []>} : vector<8x33xbf16>, vector<33x8xbf16>, vector<8x8xf32> -> vector<8x8xf32>
    %c0_34 = arith.constant 0 : index
    %c0_35 = arith.constant 0 : index
    %45 = vector.load %arg7[%c0_34, %c0_35] : memref<8x33xbf16, #tpu.memory_space<vmem>>, vector<8x33xbf16>
    %c0_36 = arith.constant 0 : index
    %c0_37 = arith.constant 0 : index
    %c0_38 = arith.constant 0 : index
    %46 = vector.load %arg3[%c0_36, %c0_37, %c0_38] : memref<1x33x8xbf16, #tpu.memory_space<vmem>>, vector<1x33x8xbf16>
    %47 = vector.shape_cast %46 : vector<1x33x8xbf16> to vector<33x8xbf16>
    %cst_39 = arith.constant dense<0.000000e+00> : vector<8x8xf32>
    %48 = tpu.matmul %45, %47, %cst_39 {dimension_numbers = #tpu.dot_dimension_numbers<[1], [0], [0], [1], [0, 0, 1, 1], [], []>} : vector<8x33xbf16>, vector<33x8xbf16>, vector<8x8xf32> -> vector<8x8xf32>
    %49 = arith.truncf %44 : vector<8x8xf32> to vector<8x8xbf16>
    %50 = arith.truncf %40 : vector<8x384xf32> to vector<8x384xbf16>
    %cst_40 = arith.constant dense<0.000000e+00> : vector<8x384xf32>
    %51 = tpu.matmul %49, %50, %cst_40 {dimension_numbers = #tpu.dot_dimension_numbers<[1], [0], [0], [1], [0, 0, 1, 1], [], []>} : vector<8x8xbf16>, vector<8x384xbf16>, vector<8x384xf32> -> vector<8x384xf32>
    %cst_41 = arith.constant dense<0xFF800000> : vector<384xf32>
    %52 = vector.multi_reduction <maximumf>, %51, %cst_41 [0] : vector<8x384xf32> to vector<384xf32>
    %53 = vector.shape_cast %52 : vector<384xf32> to vector<1x384xf32>
    %54 = vector.broadcast %53 : vector<1x384xf32> to vector<8x384xf32>
    %55 = arith.subf %51, %54 : vector<8x384xf32>
    %56 = math.exp %55 : vector<8x384xf32>
    %cst_42 = arith.constant dense<0.000000e+00> : vector<384xf32>
    %57 = vector.multi_reduction <add>, %56, %cst_42 [0] : vector<8x384xf32> to vector<384xf32>
    %58 = vector.shape_cast %57 : vector<384xf32> to vector<1x384xf32>
    %59 = vector.broadcast %58 : vector<1x384xf32> to vector<8x384xf32>
    %60 = arith.divf %56, %59 : vector<8x384xf32>
    %61 = arith.truncf %48 : vector<8x8xf32> to vector<8x8xbf16>
    %62 = arith.truncf %60 : vector<8x384xf32> to vector<8x384xbf16>
    %cst_43 = arith.constant dense<0.000000e+00> : vector<8x384xf32>
    %63 = tpu.matmul %61, %62, %cst_43 {dimension_numbers = #tpu.dot_dimension_numbers<[1], [0], [0], [1], [0, 0, 1, 1], [], []>} : vector<8x8xbf16>, vector<8x384xbf16>, vector<8x384xf32> -> vector<8x384xf32>
    %64 = vector.broadcast %3 : vector<8x1xf32> to vector<8x384xf32>
    %65 = arith.mulf %63, %64 : vector<8x384xf32>
    %66 = vector.broadcast %4 : vector<8x1xf32> to vector<8x384xf32>
    %67 = arith.addf %65, %66 : vector<8x384xf32>
    %68 = vector.broadcast %6 : vector<1x384xf32> to vector<8x384xf32>
    %69 = arith.mulf %67, %68 : vector<8x384xf32>
    %c0_44 = arith.constant 0 : index
    %c128_45 = arith.constant 128 : index
    %70 = vector.load %arg12[%c0_44, %c128_45] : memref<8x537xf32, #tpu.memory_space<vmem>>, vector<8x384xf32>
    tpu.vector_store %arg12[%c0_44, %c128_45], %69 {strides = array<i32>} : memref<8x537xf32, #tpu.memory_space<vmem>>, vector<8x384xf32>,
    %c0_46 = arith.constant 0 : index
    %c103_47 = arith.constant 103 : index
    %71 = vector.load %arg12[%c0_46, %c103_47] : memref<8x537xf32, #tpu.memory_space<vmem>>, vector<8x384xf32>
    %c0_48 = arith.constant 0 : index
    %c104_49 = arith.constant 104 : index
    %72 = vector.load %arg12[%c0_48, %c104_49] : memref<8x537xf32, #tpu.memory_space<vmem>>, vector<8x384xf32>
    %c0_50 = arith.constant 0 : index
    %c105_51 = arith.constant 105 : index
    %73 = vector.load %arg12[%c0_50, %c105_51] : memref<8x537xf32, #tpu.memory_space<vmem>>, vector<8x384xf32>
    %c0_52 = arith.constant 0 : index
    %c127_53 = arith.constant 127 : index
    %74 = vector.load %arg12[%c0_52, %c127_53] : memref<8x537xf32, #tpu.memory_space<vmem>>, vector<8x384xf32>
    %c0_54 = arith.constant 0 : index
    %c128_55 = arith.constant 128 : index
    %75 = vector.load %arg12[%c0_54, %c128_55] : memref<8x537xf32, #tpu.memory_space<vmem>>, vector<8x384xf32>
    %c0_56 = arith.constant 0 : index
    %c129_57 = arith.constant 129 : index
    %76 = vector.load %arg12[%c0_56, %c129_57] : memref<8x537xf32, #tpu.memory_space<vmem>>, vector<8x384xf32>
    %c0_58 = arith.constant 0 : index
    %c151_59 = arith.constant 151 : index
    %77 = vector.load %arg12[%c0_58, %c151_59] : memref<8x537xf32, #tpu.memory_space<vmem>>, vector<8x384xf32>
    %c0_60 = arith.constant 0 : index
    %c152_61 = arith.constant 152 : index
    %78 = vector.load %arg12[%c0_60, %c152_61] : memref<8x537xf32, #tpu.memory_space<vmem>>, vector<8x384xf32>
    %c0_62 = arith.constant 0 : index
    %c153_63 = arith.constant 153 : index
    %79 = vector.load %arg12[%c0_62, %c153_63] : memref<8x537xf32, #tpu.memory_space<vmem>>, vector<8x384xf32>
    %80 = tpu.concatenate %71, %72, %73, %74, %75, %76, %77, %78, %79 in 0 : vector<8x384xf32>, vector<8x384xf32>, vector<8x384xf32>, vector<8x384xf32>, vector<8x384xf32>, vector<8x384xf32>, vector<8x384xf32>, vector<8x384xf32>, vector<8x384xf32> -> vector<72x384xf32>
    %81 = arith.truncf %80 : vector<72x384xf32> to vector<72x384xbf16>
    %c0_64 = arith.constant 0 : index
    %c0_65 = arith.constant 0 : index
    %82 = vector.load %arg8[%c0_64, %c0_65] : memref<8x72xbf16, #tpu.memory_space<vmem>>, vector<8x72xbf16>
    %cst_66 = arith.constant dense<0.000000e+00> : vector<8x384xf32>
    %83 = tpu.matmul %82, %81, %cst_66 {dimension_numbers = #tpu.dot_dimension_numbers<[1], [0], [0], [1], [0, 0, 1, 1], [], []>} : vector<8x72xbf16>, vector<72x384xbf16>, vector<8x384xf32> -> vector<8x384xf32>
    %84 = vector.broadcast %5 : vector<8x1xf32> to vector<8x384xf32>
    %85 = arith.addf %83, %84 : vector<8x384xf32>
    %86 = arith.negf %85 : vector<8x384xf32>
    %87 = math.exp %86 : vector<8x384xf32>
    %cst_67 = arith.constant 1.000000e+00 : f32
    %88 = vector.broadcast %cst_67 : f32 to vector<8x384xf32>
    %89 = arith.addf %88, %87 : vector<8x384xf32>
    %90 = arith.divf %88, %89 : vector<8x384xf32>
    %91 = arith.mulf %85, %90 : vector<8x384xf32>
    %92 = vector.shape_cast %91 : vector<8x384xf32> to vector<1x8x384xf32>
    %c0_68 = arith.constant 0 : index
    %c0_69 = arith.constant 0 : index
    %c0_70 = arith.constant 0 : index
    %93 = vector.load %arg11[%c0_68, %c0_69, %c0_70] : memref<1x8x384xf32, #tpu.memory_space<vmem>>, vector<1x8x384xf32>
    tpu.vector_store %arg11[%c0_68, %c0_69, %c0_70], %92 {strides = array<i32>} : memref<1x8x384xf32, #tpu.memory_space<vmem>>, vector<1x8x384xf32>,
    return
  }
  func.func @transform_0(%arg0: i32) -> (i32, i32, i32) {
    %c0_i32 = arith.constant 0 : i32
    %c0_i32_0 = arith.constant 0 : i32
    %c0_i32_1 = arith.constant 0 : i32
    return %arg0, %c0_i32, %c0_i32_0 : i32, i32, i32
  }
  func.func @transform_1(%arg0: i32) -> (i32, i32, i32) {
    %c0_i32 = arith.constant 0 : i32
    %c0_i32_0 = arith.constant 0 : i32
    %c0_i32_1 = arith.constant 0 : i32
    return %arg0, %c0_i32, %c0_i32_0 : i32, i32, i32
  }
  func.func @transform_2(%arg0: i32) -> (i32, i32, i32) {
    %c0_i32 = arith.constant 0 : i32
    %c0_i32_0 = arith.constant 0 : i32
    %c0_i32_1 = arith.constant 0 : i32
    return %arg0, %c0_i32, %c0_i32_0 : i32, i32, i32
  }
  func.func @transform_3(%arg0: i32) -> (i32, i32) {
    %c0_i32 = arith.constant 0 : i32
    %c0_i32_0 = arith.constant 0 : i32
    %c0_i32_1 = arith.constant 0 : i32
    return %c0_i32, %c0_i32_0 : i32, i32
  }
  func.func @transform_4(%arg0: i32) -> (i32, i32) {
    %c0_i32 = arith.constant 0 : i32
    %c0_i32_0 = arith.constant 0 : i32
    %c0_i32_1 = arith.constant 0 : i32
    return %c0_i32, %c0_i32_0 : i32, i32
  }
  func.func @transform_5(%arg0: i32) -> (i32, i32) {
    %c0_i32 = arith.constant 0 : i32
    %c0_i32_0 = arith.constant 0 : i32
    %c0_i32_1 = arith.constant 0 : i32
    return %c0_i32, %c0_i32_0 : i32, i32
  }
  func.func @transform_6(%arg0: i32) -> (i32, i32) {
    %c0_i32 = arith.constant 0 : i32
    %c0_i32_0 = arith.constant 0 : i32
    %c0_i32_1 = arith.constant 0 : i32
    return %c0_i32, %c0_i32_0 : i32, i32
  }
  func.func @transform_7(%arg0: i32) -> (i32, i32) {
    %c0_i32 = arith.constant 0 : i32
    %c0_i32_0 = arith.constant 0 : i32
    %c0_i32_1 = arith.constant 0 : i32
    return %c0_i32, %c0_i32_0 : i32, i32
  }
  func.func @transform_8(%arg0: i32) -> (i32, i32) {
    %c0_i32 = arith.constant 0 : i32
    %c0_i32_0 = arith.constant 0 : i32
    %c0_i32_1 = arith.constant 0 : i32
    return %c0_i32, %c0_i32_0 : i32, i32
  }
  func.func @transform_9(%arg0: i32) -> (i32, i32) {
    %c0_i32 = arith.constant 0 : i32
    %c0_i32_0 = arith.constant 0 : i32
    %c0_i32_1 = arith.constant 0 : i32
    return %c0_i32, %c0_i32_0 : i32, i32
  }
  func.func @transform_10(%arg0: i32) -> (i32, i32, i32) {
    %c0_i32 = arith.constant 0 : i32
    %c0_i32_0 = arith.constant 0 : i32
    %c0_i32_1 = arith.constant 0 : i32
    return %arg0, %c0_i32, %c0_i32_0 : i32, i32, i32
  }
}

</mosaic_0001>

<bundles_post_ra>
// kernel: midblock_forward.1
= control target key start
LH: loop header
LB: loop body
LE: loop exit
PB: predicated region body
PF: predicated region fallthrough
CT: control target
= control target key end

     0   :  { %s2153_s13 = smov 0   ;;  %s2576_s0 = inlined_call_operand.vmem [shape: bf16[2,8,384], index: 0, kind: input, shape index: {}]   ;;  %s2577_s1 = inlined_call_operand.vmem [shape: bf16[2,8,33], index: 1, kind: input, shape index: {}]   ;;  %s2578_s2 = inlined_call_operand.vmem [shape: bf16[2,33,8], index: 2, kind: input, shape index: {}]   ;;  %s2579_s3 = inlined_call_operand.vmem [shape: bf16[8,72], index: 3, kind: input, shape index: {}]   ;;  %s2580_s4 = inlined_call_operand.vmem [shape: bf16[8,8], index: 4, kind: input, shape index: {}]   ;;  %s2581_s5 = inlined_call_operand.vmem [shape: bf16[33,8], index: 5, kind: input, shape index: {}]   ;;  %s2582_s6 = inlined_call_operand.vmem [shape: bf16[8,33], index: 6, kind: input, shape index: {}]   ;;  %s2583_s7 = inlined_call_operand.vmem [shape: bf16[8,72], index: 7, kind: input, shape index: {}]   ;;  %s2584_s8 = inlined_call_operand.vmem [shape: f32[8,8], index: 8, kind: input, shape index: {}]   ;;  %s2585_s9 = inlined_call_operand.vmem [shape: f32[1,384], index: 9, kind: input, shape index: {}]   ;;  %s2586_s10 = inlined_call_operand.vmem [shape: f32[2,8,384], index: 10, kind: output, shape index: {}]  }
   0x1 LB: > { %s1732_s14 = sadd.s32 4294967295, %s2080_s13   ;;  %p1736_p0 = scmp.ge.s32.totalorder %s2080_s13, 1  ;;  %s2080_s13 = sphi %s2153_s13, %s20_s13  }
   0x2   : > { %p331_p1 = scmp.lt.s32.totalorder %s2080_s13, 3 }
   0x4   : > { %p332_p2 = pnand %p1736_p0, %p331_p1 }
   0x5   : > { %p378_p3 = scmp.lt.s32.totalorder (!%p332_p2), %s1732_s14, 1  ;;  %s2083_s19 = smov (!%p332_p2), 80  }
   0x6   : > { %335 = sbr.rel (%p332_p2) target bundleno = 1736 (0x6c8), region = 60  ;;  %s2084_s20 = smov (!%p332_p2), 78  }
   0x7   : > { %s2085_s21 = smov (!%p332_p2), 79   ;;  %s2086_s22 = smov (!%p332_p2), 103  }
   0x8   : > { %s2087_s23 = smov (!%p332_p2), 102   ;;  %s2088_s24 = smov (!%p332_p2), 126  }
   0x9   : > { %s2089_s25 = smov (!%p332_p2), 104   ;;  %s2090_s26 = smov (!%p332_p2), 127  }
   0xa   : > { %s2091_s27 = smov (!%p332_p2), 25  }
   0xb   : > { %vm401_vm0 = vcmask 203776   ;;  %v2082_v0 = vmov 0.0   ;;  %s2588_s14 = smov (!%p378_p3, %s1732_s14), 1  ;;  %vm538_vm1 = vcmask 637952   ;;  %vm506_vm2 = vcmask 654336  }
   0xc   : > { %402 = vst.msk [vmem:[#allocation2 + $0x20] sm:$0xff] %vm401_vm0, %v2082_v0  ;;  %400 = vst [vmem:[#allocation2] sm:$0xff] %v2082_v0  ;;  %1798 = vmatprep.subr.bf16.mxu1 %v2082_v0  ;;  %s1864_s15 = smul.u32 12, %s2588_s14  ;;  %vm522_vm3 = vcmask 646144   ;;  %vm490_vm4 = vcmask 834560   ;;  %vm474_vm5 = vcmask 842752  }
   0xd   : > { %vm444_vm6 = vcmask 1031168   ;;  %vm460_vm7 = vcmask 850944   ;;  %vm428_vm8 = vcmask 1039360   ;;  %vm2093_vm9 = vmmov 0   ;;  %s1865_s12 = smul.u32 20, %s2588_s14 }
   0xe   : > { %s382_s18 = scalar_lea.vmem %s2576_s0, %s1864_s15  ;;  %1808 = vmatprep.mubr.msk.bf16.mxu1 %vm2093_vm9, %v2082_v0  ;;  %vm664_vm10 = vcmask 1043456   ;;  %vm660_vm11 = vcmask 588800   ;;  %vm903_vm12 = vcmask 1040384   ;;  %vm784_vm13 = vcmask 64512   ;;  %s1738_s15 = sshll.u32 %s2588_s14, 2 }
   0xf   : > { %v2171_v1 = vld [vmem:[%s382_s18] sm:$0xff]  ;;  %v404_v2 = vld [vmem:[%s382_s18 + $0x8] sm:$0xf]  ;;  %s2332_s17 = scalar_lea.vmem %s2578_s2, %s1865_s12  ;;  %s386_s30 = scalar_lea.vmem %s2577_s1, %s1738_s15  ;;  %vm899_vm14 = vcmask 269312  }
  0x10   : > { %v405_v3 = vunpack.c.l.bf16 %v2171_v1  ;;  %v406_v4 = vunpack.c.h.bf16 %v2171_v1  ;;  %v2175_v5 = vunpack.c.l.bf16 %v404_v2 }
  0x12   : > { %v1901_v7 = vpack.i.bf16 %v406_v4, %v405_v3  ;;  %v1926_v9 = vpack.i.bf16 %v2082_v0, %v2175_v5 }
  0x13   : > { %v2177_v6 = vld [vmem:[#allocation2 + $0x20] sm:$0xff] }
  0x14   : > { %1902 = vrot.lane.b32.xlu1 %v1901_v7, %s2083_s19  ;;  %1892 = vrot.lane.b32.xlu0 %v1901_v7, %s2084_s20  ;;  %v1896_v8 = vpack.i.bf16 %v2177_v6, %v2175_v5 }
  0x18   : > { %502 = vrot.lane.b32.xlu1 %v2175_v5, %s2083_s19  ;;  %1897 = vrot.lane.b32.xlu0 %v1896_v8, %s2084_s20 }
  0x1c   : > { %518 = vrot.lane.b32.xlu1 %v2175_v5, %s2085_s21  ;;  %1907 = vrot.lane.b32.xlu0 %v1901_v7, %s2085_s21 }
  0x20   : > { %472 = vrot.lane.b32.xlu1 %v2175_v5, %s2086_s22  ;;  %1912 = vrot.lane.b32.xlu0 %v1901_v7, %s2086_s22 }
  0x24   : > { %486 = vrot.lane.b32.xlu1 %v2175_v5, %s2087_s23  ;;  %1917 = vrot.lane.b32.xlu0 %v1901_v7, %s2087_s23 }
  0x28   : > { %1927 = vrot.lane.b32.xlu1 %v1926_v9, %s2088_s24  ;;  %1922 = vrot.lane.b32.xlu0 %v1901_v7, %s2088_s24 }
  0x2c   : > { %1937 = vrot.lane.b32.xlu1 %v1926_v9, %s2089_s25  ;;  %1932 = vrot.lane.b32.xlu0 %v1901_v7, %s2089_s25 }
  0x30   : > { %1947 = vrot.lane.b32.xlu1 %v1926_v9, %s2090_s26  ;;  %1942 = vrot.lane.b32.xlu0 %v1901_v7, %s2090_s26 }
  0x34   : > { %520 = vrot.lane.b32.xlu1 %v2177_v6, %s2085_s21  ;;  %504 = vrot.lane.b32.xlu0 %v2177_v6, %s2083_s19 }
  0x38   : > { %488 = vrot.lane.b32.xlu0 %v2177_v6, %s2087_s23 }
  0x86   : > { %v1903_v10 = vpop.permute.xlu1 %1902  ;;  %v1893_v11 = vpop.permute.xlu0 %1892 }
  0x87   : > { %v1894_v12 = vunpack.i.l.bf16 %v1893_v11  ;;  %v1904_v16 = vunpack.i.l.bf16 %v1903_v10  ;;  %v1895_v17 = vunpack.i.h.bf16 %v1893_v11  ;;  %v1905_v22 = vunpack.i.h.bf16 %v1903_v10 }
  0x89   : > { %v562_v13 = vpack.c.bf16 %v1894_v12, %v1894_v12  ;;  %v539_v26 = vsel %vm538_vm1, %v1894_v12, %v1895_v17  ;;  %v507_v31 = vsel %vm506_vm2, %v1904_v16, %v1905_v22 }
  0x8a   : > { %v2213_v14 = vpop.permute.xlu1 %502  ;;  %v1898_v15 = vpop.permute.xlu0 %1897  ;;  %v563_v27 = vpack.c.bf16 %v539_v26, %v539_v26 }
  0x8b   : > { %624 = vrot.lane.b32.xlu1 %v562_v13, %s2091_s27  ;;  %v1899_v28 = vunpack.i.l.bf16 %v1898_v15  ;;  %v1900_v46 = vunpack.i.h.bf16 %v1898_v15  ;;  %v508_v49 = vsel %vm506_vm2, %v1905_v22, %v2213_v14 }
  0x8d   : > { %v540_v41 = vsel %vm538_vm1, %v1895_v17, %v1899_v28  ;;  %v541_v58 = vsel %vm538_vm1, %v1899_v28, %v1900_v46  ;;  %v2092_v28 = vmov 0  }
  0x8e   : > { %v2216_v18 = vpop.permute.xlu1 %518  ;;  %v1908_v19 = vpop.permute.xlu0 %1907  ;;  %v564_v47 = vpack.c.bf16 %v540_v41, %v540_v41  ;;  %v565_v12 = vpack.c.bf16 %v541_v58, %v541_v58  ;;  %706 = vmatprep.mubr.bf16.mxu0 %v2092_v28  ;;  %1951 = vset.pattern.permute.xlu1 %v2092_v28 }
  0x8f   : > { %v1909_v20 = vunpack.i.l.bf16 %v1908_v19  ;;  %v1910_v23 = vunpack.i.h.bf16 %v1908_v19 }
  0x91   : > { %v558_v21 = vpack.c.bf16 %v1909_v20, %v1904_v16  ;;  %v523_v32 = vsel %vm522_vm3, %v1909_v20, %v1910_v23  ;;  %v524_v52 = vsel %vm522_vm3, %v1910_v23, %v2216_v18 }
  0x92   : > { %v2218_v24 = vpop.permute.xlu1 %472  ;;  %v1913_v25 = vpop.permute.xlu0 %1912  ;;  %v559_v38 = vpack.c.bf16 %v523_v32, %v507_v31  ;;  %v560_v56 = vpack.c.bf16 %v524_v52, %v508_v49 }
  0x93   : > { %616 = vrot.lane.b32.xlu0 %v558_v21, %s2091_s27  ;;  %v1914_v33 = vunpack.i.l.bf16 %v1913_v25  ;;  %v1915_v36 = vunpack.i.h.bf16 %v1913_v25 }
  0x95   : > { %v476_v45 = vsel %vm474_vm5, %v1915_v36, %v2218_v24  ;;  %v475_v9 = vsel %vm474_vm5, %v1914_v33, %v1915_v36 }
  0x96   : > { %v2222_v29 = vpop.permute.xlu1 %486  ;;  %v1918_v30 = vpop.permute.xlu0 %1917 }
  0x97   : > { %v1920_v34 = vunpack.i.h.bf16 %v1918_v30  ;;  %v1919_v35 = vunpack.i.l.bf16 %v1918_v30  ;;  %626 = vrot.lane.b32.xlu0 %v563_v27, %s2091_s27 }
  0x99   : > { %v554_v37 = vpack.c.bf16 %v1919_v35, %v1914_v33  ;;  %v492_v42 = vsel %vm490_vm4, %v1920_v34, %v2222_v29  ;;  %v491_v63 = vsel %vm490_vm4, %v1919_v35, %v1920_v34 }
  0x9a   : > { %v2227_v39 = vpop.permute.xlu1 %1927  ;;  %v1923_v40 = vpop.permute.xlu0 %1922  ;;  %v556_v48 = vpack.c.bf16 %v492_v42, %v476_v45  ;;  %v555_v11 = vpack.c.bf16 %v491_v63, %v475_v9 }
  0x9b   : > { %v1925_v43 = vunpack.i.h.bf16 %v1923_v40  ;;  %v1924_v44 = vunpack.i.l.bf16 %v1923_v40  ;;  %608 = vrot.lane.b32.xlu1 %v554_v37, %s2091_s27  ;;  %618 = vrot.lane.b32.xlu0 %v559_v38, %s2091_s27  ;;  %v1929_v59 = vunpack.i.l.bf16 %v2227_v39  ;;  %v1930_v15 = vunpack.i.h.bf16 %v2227_v39 }
  0x9d   : > { %v446_v55 = vsel %vm444_vm6, %v1924_v44, %v1925_v43  ;;  %v447_v19 = vsel %vm444_vm6, %v1925_v43, %v1929_v59  ;;  %v445_v26 = vsel %vm444_vm6, %v1930_v15, %v1924_v44 }
  0x9e   : > { %v2238_v50 = vpop.permute.xlu1 %1937  ;;  %v1933_v51 = vpop.permute.xlu0 %1932 }
  0x9f   : > { %v1935_v53 = vunpack.i.h.bf16 %v1933_v51  ;;  %v1934_v54 = vunpack.i.l.bf16 %v1933_v51  ;;  %628 = vrot.lane.b32.xlu1 %v564_v47, %s2091_s27  ;;  %612 = vrot.lane.b32.xlu0 %v556_v48, %s2091_s27  ;;  %v1939_v60 = vunpack.i.l.bf16 %v2238_v50  ;;  %v1940_v16 = vunpack.i.h.bf16 %v2238_v50 }
  0xa1   : > { %v462_v57 = vsel %vm460_vm7, %v1934_v54, %v1935_v53  ;;  %v463_v20 = vsel %vm460_vm7, %v1935_v53, %v1939_v60  ;;  %v461_v27 = vsel %vm460_vm7, %v1940_v16, %v1934_v54  ;;  %v553_v1 = vpack.c.bf16 %v1939_v60, %v1929_v59 }
  0xa2   : > { %v1943_v61 = vpop.permute.xlu0 %1942  ;;  %v551_v62 = vpack.c.bf16 %v462_v57, %v446_v55  ;;  %v1948_v8 = vpop.permute.xlu1 %1947  ;;  %v552_v23 = vpack.c.bf16 %v463_v20, %v447_v19  ;;  %v550_v32 = vpack.c.bf16 %v461_v27, %v445_v26 }
  0xa3   : > { %v1945_v2 = vunpack.i.h.bf16 %v1943_v61  ;;  %v1944_v7 = vunpack.i.l.bf16 %v1943_v61  ;;  %620 = vrot.lane.b32.xlu1 %v560_v56, %s2091_s27  ;;  %v1950_v10 = vunpack.i.h.bf16 %v1948_v8  ;;  %v1949_v21 = vunpack.i.l.bf16 %v1948_v8 }
  0xa4   : > { %602 = vrot.lane.b32.xlu0 %v551_v62, %s2091_s27 }
  0xa5   : > { %v430_v13 = vsel %vm428_vm8, %v1944_v7, %v1945_v2  ;;  %v429_v25 = vsel %vm428_vm8, %v1950_v10, %v1944_v7  ;;  %v549_v39 = vpack.c.bf16 %v1949_v21, %v2175_v5  ;;  %v566_v7 = vld [vmem:[%s2579_s3] sm:$0xf] }
  0xa6   : > { %v505_v17 = vpop.permute.xlu0 %504  ;;  %v547_v22 = vpack.c.bf16 %v430_v13, %v405_v3  ;;  %v546_v31 = vpack.c.bf16 %v429_v25, %v2082_v0  ;;  %v431_v3 = vsel %vm428_vm8, %v1945_v2, %v1949_v21  ;;  %v521_v33 = vpop.permute.xlu1 %520 }
  0xa7   : > { %610 = vrot.lane.b32.xlu1 %v555_v11, %s2091_s27  ;;  %v548_v35 = vpack.c.bf16 %v431_v3, %v406_v4  ;;  %v525_v36 = vsel %vm522_vm3, %v2216_v18, %v521_v33  ;;  %v509_v37 = vsel %vm506_vm2, %v2213_v14, %v505_v17  ;;  %v2293_v4 = vld [vmem:[%s2584_s8] sm:$0xff]  ;;  %v2094_v17 = vmov 1  }
  0xa8   : > { %630 = vrot.lane.b32.xlu0 %v565_v12, %s2091_s27 }
  0xa9   : > { %1952 = vset.pattern.permute.xlu0 %v2094_v17 }
  0xaa   : > { %v489_v30 = vpop.permute.xlu0 %488 }
  0xab   : > { %604 = vrot.lane.b32.xlu1 %v552_v23, %s2091_s27  ;;  %v493_v34 = vsel %vm490_vm4, %v2222_v29, %v489_v30  ;;  %v561_v29 = vpack.c.bf16 %v525_v36, %v509_v37 }
  0xac   : > { %594 = vrot.lane.b32.xlu0 %v547_v22, %s2091_s27  ;;  %v557_v38 = vpack.c.bf16 %v493_v34, %v2218_v24 }
  0xaf   : > { %600 = vrot.lane.b32.xlu1 %v550_v32, %s2091_s27 }
  0xb0   : > { %592 = vrot.lane.b32.xlu0 %v546_v31, %s2091_s27 }
  0xb3   : > { %596 = vrot.lane.b32.xlu1 %v548_v35, %s2091_s27 }
  0xb4   : > { %614 = vrot.lane.b32.xlu0 %v557_v38, %s2091_s27 }
  0xb7   : > { %622 = vrot.lane.b32.xlu1 %v561_v29, %s2091_s27 }
  0xb8   : > { %598 = vrot.lane.b32.xlu0 %v549_v39, %s2091_s27 }
  0xbb   : > { %606 = vrot.lane.b32.xlu1 %v553_v1, %s2091_s27 }
  0xbc   : > { %781 = vperm.xlu0 %1952, %v2293_v4  }
  0xbf   : > { %569 = vperm.xlu1 %1951, %v2293_v4  }
  0xfd   : > { %v625_v5 = vpop.permute.xlu1 %624 }
 0x105   : > { %v617_v14 = vpop.permute.xlu0 %616 }
 0x109   : > { %v627_v18 = vpop.permute.xlu0 %626 }
 0x10a   : > { %v645_v41 = vsel %vm401_vm0, %v625_v5, %v627_v18 }
 0x10b   : > { %v666_v45 = vsel %vm664_vm10, %v645_v41, 0  ;;  %v2031_v41 = vld [vmem:[%s2581_s5 + $0x10] ss:$0 sps:$4 sm:$0x11]  }
 0x10d   : > { %v609_v24 = vpop.permute.xlu1 %608  ;;  %v619_v40 = vpop.permute.xlu0 %618 }
 0x10e   : > { %v642_v49 = vsel %vm401_vm0, %v617_v14, %v619_v40 }
 0x111   : > { %v629_v42 = vpop.permute.xlu1 %628  ;;  %v613_v43 = vpop.permute.xlu0 %612 }
 0x112   : > { %v646_v44 = vsel %vm401_vm0, %v627_v18, %v629_v42 }
 0x113   : > { %1741 = vmatprep.subr.msk.bf16.mxu0 %vm664_vm10, %v646_v44 }
 0x114   : > { %681 = vmatpush1.bf16.msra.mxu0 %v666_v45  ;;  %v776_v45 = vld [vmem:[%s2580_s4] sm:$0xf] }
 0x115   : > { %v621_v46 = vpop.permute.xlu1 %620 }
 0x116   : > { %v603_v47 = vpop.permute.xlu0 %602  ;;  %v643_v48 = vsel %vm401_vm0, %v619_v40, %v621_v46 }
 0x117   : > { %682 = vmatprep.subr.bf16.mxu0 %v643_v48 }
 0x118   : > { %683 = vmatpush1.bf16.msra.mxu0 %v642_v49 }
 0x119   : > { %v611_v50 = vpop.permute.xlu1 %610 }
 0x11a   : > { %v631_v51 = vpop.permute.xlu0 %630  ;;  %v640_v52 = vsel %vm401_vm0, %v611_v50, %v613_v43  ;;  %v639_v53 = vsel %vm401_vm0, %v609_v24, %v611_v50  ;;  %v2033_v50 = vld [vmem:[%s2581_s5] sm:$0xff]  }
 0x11b   : > { %684 = vmatprep.subr.bf16.mxu0 %v640_v52  ;;  %v647_v54 = vsel %vm401_vm0, %v629_v42, %v631_v51  ;;  %v2034_v51 = vld [vmem:[%s2332_s17 + $0x10] ss:$0 sps:$4 sm:$0x11]  }
 0x11c   : > { %685 = vmatpush1.bf16.msra.mxu0 %v639_v53  ;;  %v672_v55 = vsel %vm664_vm10, %v647_v54, 0  ;;  %v878_v54 = vld [vmem:[%s386_s30] sm:$0xf] }
 0x11d   : > { %v605_v56 = vpop.permute.xlu1 %604  ;;  %1799 = vmatpush3.bf16.msra.mxu1 %v672_v55 }
 0x11e   : > { %v595_v57 = vpop.permute.xlu0 %594  ;;  %v637_v58 = vsel %vm401_vm0, %v603_v47, %v605_v56  ;;  %1800 = vmatprep.subr.bf16.mxu1 %v2082_v0 }
 0x11f   : > { %686 = vmatprep.subr.bf16.mxu0 %v637_v58  ;;  %v949_v58 = vld [vmem:[%s2582_s6] sm:$0xf] }
 0x121   : > { %v601_v59 = vpop.permute.xlu1 %600 }
 0x122   : > { %v636_v60 = vsel %vm401_vm0, %v601_v59, %v603_v47  ;;  %v593_v61 = vpop.permute.xlu0 %592  ;;  %v2032_v47 = vld [vmem:[%s2581_s5 + $0x8] sm:$0xff]  }
 0x123   : > { %687 = vmatpush1.bf16.msra.mxu0 %v636_v60  ;;  %v633_v63 = vsel %vm401_vm0, %v593_v61, %v595_v57 }
 0x125   : > { %v597_v62 = vpop.permute.xlu1 %596 }
 0x126   : > { %v634_v2 = vsel %vm401_vm0, %v595_v57, %v597_v62  ;;  %v615_v10 = vpop.permute.xlu0 %614  ;;  %v2036_v57 = vld [vmem:[%s2332_s17] sm:$0xff]  }
 0x127   : > { %688 = vmatprep.subr.bf16.mxu0 %v634_v2  ;;  %v641_v11 = vsel %vm401_vm0, %v613_v43, %v615_v10  ;;  %v905_v43 = vsel %vm903_vm12, 65535, %v2092_v28 }
 0x128   : > { %689 = vmatpush1.bf16.msra.mxu0 %v633_v63  ;;  %v974_v55 = vand.u32 %v2034_v51, %v905_v43 }
 0x129   : > { %v623_v8 = vpop.permute.xlu1 %622 }
 0x12a   : > { %v644_v9 = vsel %vm401_vm0, %v621_v46, %v623_v8  ;;  %v599_v15 = vpop.permute.xlu0 %598  ;;  %v907_v46 = vand.u32 %v2031_v41, %v905_v43 }
 0x12b   : > { %1742 = vmatmul.mubr.msk.bf16.vlgmr.msra.gmra.mxu0 %vm660_vm11, %v566_v7  ;;  %1801 = vmatpush3.bf16.msra.mxu1 %v644_v9  ;;  %v635_v16 = vsel %vm401_vm0, %v597_v62, %v599_v15 }
 0x12c   : > { %1802 = vmatprep.subr.bf16.mxu1 %v2082_v0  ;;  %829 = vmatprep.mubr.bf16.mxu0 %v2092_v28 }
 0x12d   : > { %v607_v12 = vpop.permute.xlu1 %606 }
 0x12e   : > { %v638_v13 = vsel %vm401_vm0, %v605_v56, %v607_v12  ;;  %v2035_v56 = vld [vmem:[%s2332_s17 + $0x8] sm:$0xff]  }
 0x12f   : > { %1803 = vmatpush3.bf16.msra.mxu1 %v641_v11 }
 0x130   : > { %1804 = vmatprep.subr.bf16.mxu1 %v2082_v0 }
 0x133   : > { %1805 = vmatpush3.bf16.msra.mxu1 %v638_v13 }
 0x134   : > { %1806 = vmatprep.subr.bf16.mxu1 %v2082_v0 }
 0x137   : > { %1807 = vmatpush3.bf16.msra.mxu1 %v635_v16  ;;  %v782_v59 = vpop.permute.xlu0 %781 }
 0x138   : > { %1812 = vmatprep.subr.bf16.mxu1 %v2082_v0 }
 0x13a   : > { %1809 = vmatmul.mubr.msk.bf16.vlgmr.msra.gmra.mxu1 %vm660_vm11, %v566_v7  ;;  %v570_v19 = vpop.permute.xlu1 %569 }
 0x13b   : > { %1814 = vmatprep.mubr.msk.bf16.mxu1 %vm2093_vm9, %v2082_v0 }
 0x1eb   : > { %v708_v20 = vpop.f32.mrf.mxu0 }
 0x1ec   : > { %v709_v21 = vadd.f32 %v708_v20, %v570_v19 }
 0x1ed   : > { %v710_v22 = vpop.f32.mrf.mxu0 }
 0x1ee   : > { %v1744_v23 = vmul.f32 -1.442695, %v709_v21  ;;  %v711_v25 = vadd.f32 %v710_v22, %v570_v19 }
 0x1ef   : > { %v712_v26 = vpop.f32.mrf.mxu0 }
 0x1f0   : > { %2037 = vpow2.f32 %v1744_v23  ;;  %v1745_v27 = vmul.f32 -1.442695, %v711_v25 }
 0x1f1   : > { %v713_v30 = vpop.f32.mrf.mxu0 }
 0x1f2   : > { %2039 = vpow2.f32 %v1745_v27 }
 0x1fa   : > { %v749_v31 = vpop.f32.mrf.mxu1 }
 0x1fb   : > { %v750_v3 = vadd.f32 %v749_v31, %v570_v19 }
 0x1fc   : > { %v1810_v32 = vpop.f32.mrf.mxu1 }
 0x1fd   : > { %v2038_v33 = vpop.eup %2037  ;;  %v1746_v34 = vmul.f32 -1.442695, %v750_v3  ;;  %v2096_v32 = vmov 3  }
 0x1fe   : > { %v764_v35 = vadd.f32 1.0, %v2038_v33  ;;  %v752_v36 = vpop.f32.mrf.mxu1 }
 0x1ff   : > { %v2040_v37 = vpop.eup %2039  ;;  %2041 = vpow2.f32 %v1746_v34 }
 0x200   : > { %2043 = vrcp.f32 %v764_v35  ;;  %v765_v38 = vadd.f32 1.0, %v2040_v37  ;;  %v1811_v29 = vpop.f32.mrf.mxu1 }
 0x202   : > { %2045 = vrcp.f32 %v765_v38 }
 0x20c   : > { %v2042_v39 = vpop.eup %2041 }
 0x20d   : > { %v2044_v1 = vpop.eup %2043  ;;  %v766_v14 = vadd.f32 1.0, %v2042_v39 }
 0x20e   : > { %v773_v5 = vmul.f32 %v2044_v1, %v709_v21 }
 0x20f   : > { %v2046_v18 = vpop.eup %2045  ;;  %2047 = vrcp.f32 %v766_v14 }
 0x210   : > { %v777_v24 = vpack.c.bf16 %v773_v5, %v773_v5  ;;  %v774_v40 = vmul.f32 %v2046_v18, %v711_v25 }
 0x212   : > { %v778_v42 = vpack.c.bf16 %v774_v40, %v774_v40  ;;  %v789_v44 = vsel %vm664_vm10, %v777_v24, 0 }
 0x214   : > { %1747 = vmatprep.subr.msk.bf16.mxu0 %vm664_vm10, %v778_v42 }
 0x215   : > { %812 = vmatpush1.bf16.msra.mxu0 %v789_v44 }
 0x216   : > { %1818 = vmatprep.subr.bf16.mxu0 %v2082_v0 }
 0x218   : > { %1748 = vmatmul.mubr.msk.bf16.vlgmr.msra.gmra.mxu0 %vm784_vm13, %v776_v45 }
 0x219   : > { %1819 = vmatpush3.bf16.msra.mxu0 %v907_v46  ;;  %1824 = vmatprep.mubr.msk.bf16.mxu0 %vm2093_vm9, %v2082_v0 }
 0x21a   : > { %1820 = vmatprep.subr.bf16.mxu0 %v2082_v0 }
 0x21c   : > { %v2048_v48 = vpop.eup %2047 }
 0x21d   : > { %v775_v49 = vmul.f32 %v2048_v48, %v750_v3  ;;  %1821 = vmatpush3.bf16.msra.mxu0 %v2032_v47  ;;  %v2095_v3 = vmov 2  }
 0x21e   : > { %1822 = vmatprep.subr.bf16.mxu0 %v2082_v0  ;;  %1953 = vset.pattern.permute.xlu1 %v2095_v3 }
 0x21f   : > { %v779_v52 = vpack.c.bf16 %v775_v49, %v775_v49  ;;  %1262 = vperm.xlu1 %1953, %v2293_v4  }
 0x221   : > { %1823 = vmatpush3.bf16.msra.mxu0 %v2033_v50  ;;  %v795_v53 = vsel %vm664_vm10, %v779_v52, 0 }
 0x222   : > { %1813 = vmatpush3.bf16.msra.mxu1 %v795_v53 }
 0x223   : > { %1828 = vmatprep.subr.bf16.mxu1 %v2082_v0  ;;  %1954 = vset.pattern.permute.xlu1 %v2096_v32 }
 0x224   : > { %1825 = vmatmul.mubr.msk.bf16.vlgmr.msra.gmra.mxu0 %vm899_vm14, %v878_v54  ;;  %1269 = vperm.xlu1 %1954, %v2293_v4  }
 0x225   : > { %1815 = vmatmul.mubr.msk.bf16.vlgmr.msra.gmra.mxu1 %vm784_vm13, %v776_v45  ;;  %1064 = vmatprep.mubr.bf16.mxu0 %v2092_v28 }
 0x226   : > { %1829 = vmatpush3.bf16.msra.mxu1 %v974_v55  ;;  %1834 = vmatprep.mubr.msk.bf16.mxu1 %vm2093_vm9, %v2082_v0 }
 0x227   : > { %1830 = vmatprep.subr.bf16.mxu1 %v2082_v0 }
 0x22a   : > { %1831 = vmatpush3.bf16.msra.mxu1 %v2035_v56 }
 0x22b   : > { %1832 = vmatprep.subr.bf16.mxu1 %v2082_v0 }
 0x22e   : > { %1833 = vmatpush3.bf16.msra.mxu1 %v2036_v57 }
 0x22f   : > { %1838 = vmatprep.subr.bf16.mxu1 %v2082_v0 }
 0x231   : > { %1835 = vmatmul.mubr.msk.bf16.vlgmr.msra.gmra.mxu1 %vm899_vm14, %v949_v58 }
 0x232   : > { %1840 = vmatprep.mubr.msk.bf16.mxu1 %vm2093_vm9, %v2082_v0 }
 0x2d8   : > { %v831_v60 = vpop.f32.mrf.mxu0 }
 0x2d9   : > { %v832_v61 = vadd.f32 %v831_v60, %v782_v59 }
 0x2da   : > { %v833_v62 = vpop.f32.mrf.mxu0 }
 0x2db   : > { %v834_v63 = vadd.f32 %v833_v62, %v782_v59  ;;  %v1017_v2 = vpack.c.bf16 %v832_v61, %v832_v61 }
 0x2dc   : > { %v835_v7 = vpop.f32.mrf.mxu0 }
 0x2dd   : > { %v1018_v8 = vpack.c.bf16 %v834_v63, %v834_v63  ;;  %v1024_v9 = vsel %vm664_vm10, %v1017_v2, 0 }
 0x2de   : > { %v836_v10 = vpop.f32.mrf.mxu0 }
 0x2df   : > { %1758 = vmatprep.subr.msk.bf16.mxu0 %vm664_vm10, %v1018_v8 }
 0x2e0   : > { %1047 = vmatpush1.bf16.msra.mxu0 %v1024_v9 }
 0x2e4   : > { %v943_v11 = vpop.f32.mrf.mxu0 }
 0x2e5   : > { %v1016_v12 = vpack.c.bf16 %v943_v11, %v943_v11  ;;  %v872_v13 = vpop.f32.mrf.mxu1 }
 0x2e6   : > { %v873_v15 = vadd.f32 %v872_v13, %v782_v59  ;;  %v1826_v16 = vpop.f32.mrf.mxu0 }
 0x2e7   : > { %v1816_v17 = vpop.f32.mrf.mxu1  ;;  %1759 = vmatmul.mubr.msk.bf16.vlgmr.msra.gmra.mxu0 %vm784_vm13, %v1016_v12 }
 0x2e8   : > { %v1019_v19 = vpack.c.bf16 %v873_v15, %v873_v15  ;;  %v946_v20 = vpop.f32.mrf.mxu0  ;;  %1212 = vmatprep.mubr.bf16.mxu0 %v2092_v28 }
 0x2e9   : > { %v875_v21 = vpop.f32.mrf.mxu1 }
 0x2ea   : > { %v1030_v22 = vsel %vm664_vm10, %v1019_v19, 0  ;;  %v1827_v23 = vpop.f32.mrf.mxu0 }
 0x2eb   : > { %v1817_v25 = vpop.f32.mrf.mxu1  ;;  %1839 = vmatpush3.bf16.msra.mxu1 %v1030_v22 }
 0x2ec   : > { %1844 = vmatprep.subr.bf16.mxu1 %v2082_v0 }
 0x2ee   : > { %1841 = vmatmul.mubr.msk.bf16.vlgmr.msra.gmra.mxu1 %vm784_vm13, %v1016_v12 }
 0x2ef   : > { %1846 = vmatprep.mubr.msk.bf16.mxu1 %vm2093_vm9, %v2082_v0 }
 0x2f1   : > { %v2387_v26 = vpop.f32.mrf.mxu1 }
 0x2f3   : > { %v1836_v27 = vpop.f32.mrf.mxu1 }
 0x2f5   : > { %v1013_v30 = vpop.f32.mrf.mxu1 }
 0x2f7   : > { %v1837_v31 = vpop.f32.mrf.mxu1 }
 0x3a7   : > { %v1066_v33 = vpop.f32.mrf.mxu0 }
 0x3a8   : > { %v1113_v34 = vrot.slane %v1066_v33, 4 }
 0x3a9   : > { %v1068_v35 = vpop.f32.mrf.mxu0 }
 0x3aa   : > { %v1114_v36 = vmax.f32 %v1066_v33, %v1113_v34  ;;  %v1119_v37 = vrot.slane %v1068_v35, 4 }
 0x3ab   : > { %v1070_v38 = vpop.f32.mrf.mxu0 }
 0x3ac   : > { %v1115_v29 = vrot.slane %v1114_v36, 2  ;;  %v1120_v39 = vmax.f32 %v1068_v35, %v1119_v37 }
 0x3ad   : > { %v1071_v1 = vpop.f32.mrf.mxu0 }
 0x3ae   : > { %v1116_v14 = vmax.f32 %v1114_v36, %v1115_v29  ;;  %v1121_v5 = vrot.slane %v1120_v39, 2  ;;  %v1107_v18 = vpop.f32.mrf.mxu1  ;;  %v1164_v36 = vpack.c.bf16 %v2387_v26, %v2387_v26  ;;  %v1276_v29 = vlaneseq  ;;  %v1263_v1 = vpop.permute.xlu1 %1262  ;;  %v399_v26 = vld [vmem:[%s2585_s9] sm:$0x7] }
 0x3af   : > { %v1125_v24 = vrot.slane %v1107_v18, 4 }
 0x3b0   : > { %v1117_v40 = vrot.slane %v1116_v14, 1  ;;  %v1122_v41 = vmax.f32 %v1120_v39, %v1121_v5  ;;  %v1842_v42 = vpop.f32.mrf.mxu1  ;;  %v1277_v39 = vshrl.u32 %v1276_v29, 7 }
 0x3b1   : > { %v1126_v43 = vmax.f32 %v1107_v18, %v1125_v24 }
 0x3b2   : > { %v1118_v44 = vmax.f32 %v1116_v14, %v1117_v40  ;;  %v1123_v45 = vrot.slane %v1122_v41, 1  ;;  %v1110_v46 = vpop.f32.mrf.mxu1  ;;  %v1278_v14 = vsub.s32 0, %v1277_v39  ;;  %v1282_v5 = vsub.s32 1, %v1277_v39  ;;  %v1270_v24 = vpop.permute.xlu1 %1269 }
 0x3b3   : > { %v1127_v47 = vrot.slane %v1126_v43, 2  ;;  %v1286_v42 = vsub.s32 2, %v1277_v39 }
 0x3b4   : > { %v1131_v48 = vsub.f32 %v1066_v33, %v1118_v44  ;;  %v1124_v49 = vmax.f32 %v1122_v41, %v1123_v45  ;;  %v1843_v50 = vpop.f32.mrf.mxu1  ;;  %v1279_v40 = vrot.slane %v399_v26, %v1278_v14  ;;  %v1283_v45 = vrot.slane %v399_v26, %v1282_v5 }
 0x3b5   : > { %v1128_v51 = vmax.f32 %v1126_v43, %v1127_v47 }
 0x3b6   : > { %v1134_v52 = vmul.f32 1.442695, %v1131_v48  ;;  %v1132_v53 = vsub.f32 %v1068_v35, %v1124_v49 }
 0x3b7   : > { %v1129_v54 = vrot.slane %v1128_v51, 1 }
 0x3b8   : > { %2049 = vpow2.f32 %v1134_v52  ;;  %v1136_v55 = vmul.f32 1.442695, %v1132_v53 }
 0x3b9   : > { %v1130_v56 = vmax.f32 %v1128_v51, %v1129_v54  ;;  %v1287_v51 = vrot.slane %v399_v26, %v1286_v42 }
 0x3ba   : > { %2051 = vpow2.f32 %v1136_v55 }
 0x3bb   : > { %v1133_v57 = vsub.f32 %v1107_v18, %v1130_v56 }
 0x3bd   : > { %v1138_v58 = vmul.f32 1.442695, %v1133_v57 }
 0x3bf   : > { %2053 = vpow2.f32 %v1138_v58 }
 0x3c5   : > { %v2050_v59 = vpop.eup %2049 }
 0x3c6   : > { %v1140_v60 = vrot.slane %v2050_v59, 4 }
 0x3c7   : > { %v2052_v61 = vpop.eup %2051 }
 0x3c8   : > { %v1146_v62 = vrot.slane %v2052_v61, 4  ;;  %v1141_v63 = vadd.f32 %v2050_v59, %v1140_v60 }
 0x3ca   : > { %v1147_v2 = vadd.f32 %v2052_v61, %v1146_v62  ;;  %v1142_v7 = vrot.slane %v1141_v63, 2 }
 0x3cc   : > { %v2054_v8 = vpop.eup %2053  ;;  %v1148_v9 = vrot.slane %v1147_v2, 2  ;;  %v1143_v10 = vadd.f32 %v1142_v7, %v1141_v63 }
 0x3cd   : > { %v1152_v11 = vrot.slane %v2054_v8, 4 }
 0x3ce   : > { %v1149_v12 = vadd.f32 %v1148_v9, %v1147_v2  ;;  %v1144_v13 = vrot.slane %v1143_v10, 1 }
 0x3cf   : > { %v1153_v15 = vadd.f32 %v2054_v8, %v1152_v11 }
 0x3d0   : > { %v1150_v16 = vrot.slane %v1149_v12, 1  ;;  %v1145_v17 = vadd.f32 %v1144_v13, %v1143_v10 }
 0x3d1   : > { %v1154_v19 = vrot.slane %v1153_v15, 2 }
 0x3d2   : > { %v1151_v20 = vadd.f32 %v1150_v16, %v1149_v12  ;;  %2055 = vrcp.f32 %v1145_v17 }
 0x3d3   : > { %v1155_v21 = vadd.f32 %v1154_v19, %v1153_v15 }
 0x3d4   : > { %2057 = vrcp.f32 %v1151_v20 }
 0x3d5   : > { %v1156_v22 = vrot.slane %v1155_v21, 1 }
 0x3d7   : > { %v1157_v23 = vadd.f32 %v1156_v22, %v1155_v21 }
 0x3d9   : > { %2059 = vrcp.f32 %v1157_v23 }
 0x3df   : > { %v2056_v25 = vpop.eup %2055 }
 0x3e0   : > { %v1159_v27 = vmul.f32 %v2056_v25, %v2050_v59 }
 0x3e1   : > { %v2058_v30 = vpop.eup %2057 }
 0x3e2   : > { %v1161_v31 = vmul.f32 %v2058_v30, %v2052_v61  ;;  %v1165_v3 = vpack.c.bf16 %v1159_v27, %v1159_v27 }
 0x3e4   : > { %v1166_v32 = vpack.c.bf16 %v1161_v31, %v1161_v31  ;;  %v1172_v34 = vsel %vm664_vm10, %v1165_v3, 0 }
 0x3e6   : > { %v2060_v33 = vpop.eup %2059  ;;  %1761 = vmatprep.subr.msk.bf16.mxu0 %vm664_vm10, %v1166_v32 }
 0x3e7   : > { %1195 = vmatpush1.bf16.msra.mxu0 %v1172_v34  ;;  %v1163_v35 = vmul.f32 %v2060_v33, %v2054_v8 }
 0x3e9   : > { %v1167_v37 = vpack.c.bf16 %v1163_v35, %v1163_v35 }
 0x3ea   : > { %1762 = vmatmul.mubr.msk.bf16.vlgmr.msra.gmra.mxu0 %vm784_vm13, %v1164_v36 }
 0x3eb   : > { %v1178_v38 = vsel %vm664_vm10, %v1167_v37, 0  ;;  %1580 = vmatprep.mubr.bf16.mxu0 %v2092_v28 }
 0x3ec   : > { %1845 = vmatpush3.bf16.msra.mxu1 %v1178_v38 }
 0x3ed   : > { %1850 = vmatprep.subr.bf16.mxu1 %v2082_v0 }
 0x3ef   : > { %1847 = vmatmul.mubr.msk.bf16.vlgmr.msra.gmra.mxu1 %vm784_vm13, %v1164_v36 }
 0x3f0   : > { %1860 = vmatprep.mubr.msk.bf16.mxu1 %vm2093_vm9, %v2082_v0 }
 0x4aa   : > { %v1214_v18 = vpop.f32.mrf.mxu0 }
 0x4ab   : > { %v1265_v28 = vmul.f32 %v1263_v1, %v1214_v18 }
 0x4ac   : > { %v1216_v41 = vpop.f32.mrf.mxu0 }
 0x4ad   : > { %v1272_v43 = vadd.f32 %v1270_v24, %v1265_v28  ;;  %v1266_v44 = vmul.f32 %v1263_v1, %v1216_v41 }
 0x4ae   : > { %v1218_v46 = vpop.f32.mrf.mxu0 }
 0x4af   : > { %v2405_v47 = vmul.f32 %v1279_v40, %v1272_v43  ;;  %v1273_v48 = vadd.f32 %v1270_v24, %v1266_v44  ;;  %v1255_v49 = vpop.f32.mrf.mxu1 }
 0x4b0   : > { %v1267_v50 = vmul.f32 %v1263_v1, %v1255_v49  ;;  %v1219_v52 = vpop.f32.mrf.mxu0 }
 0x4b1   : > { %v2407_v53 = vmul.f32 %v1283_v45, %v1273_v48  ;;  %v1848_v54 = vpop.f32.mrf.mxu1 }
 0x4b2   : > { %v1274_v55 = vadd.f32 %v1270_v24, %v1267_v50 }
 0x4b3   : > { %v1258_v56 = vpop.f32.mrf.mxu1  ;;  %v1985_v57 = vpack.i.bf16 %v2407_v53, %v2405_v47 }
 0x4b4   : > { %v2411_v58 = vmul.f32 %v1287_v51, %v1274_v55 }
 0x4b5   : > { %v1849_v59 = vpop.f32.mrf.mxu1  ;;  %1986 = vrot.lane.b32.xlu0 %v1985_v57, %s2084_s20 }
 0x4b6   : > { %v1955_v60 = vpack.i.bf16 %v2177_v6, %v2411_v58  ;;  %v1975_v6 = vpack.i.bf16 %v2082_v0, %v2411_v58 }
 0x4b8   : > { %1956 = vrot.lane.b32.xlu1 %v1955_v60, %s2084_s20 }
 0x4b9   : > { %1991 = vrot.lane.b32.xlu0 %v1985_v57, %s2083_s19 }
 0x4bc   : > { %1961 = vrot.lane.b32.xlu1 %v1955_v60, %s2083_s19 }
 0x4bd   : > { %1996 = vrot.lane.b32.xlu0 %v1985_v57, %s2085_s21 }
 0x4c0   : > { %1966 = vrot.lane.b32.xlu1 %v1955_v60, %s2085_s21  ;;  %s1866_s21 = smul.u32 24, %s2588_s14 }
 0x4c1   : > { %2001 = vrot.lane.b32.xlu0 %v1985_v57, %s2086_s22 }
 0x4c4   : > { %1355 = vrot.lane.b32.xlu1 %v2411_v58, %s2086_s22 }
 0x4c5   : > { %2006 = vrot.lane.b32.xlu0 %v1985_v57, %s2087_s23 }
 0x4c8   : > { %1971 = vrot.lane.b32.xlu1 %v1955_v60, %s2087_s23 }
 0x4c9   : > { %2011 = vrot.lane.b32.xlu0 %v1985_v57, %s2088_s24 }
 0x4cc   : > { %1976 = vrot.lane.b32.xlu1 %v1975_v6, %s2088_s24  ;;  %s396_s24 = scalar_lea.vmem %s2586_s10, %s1866_s21 }
 0x4cd   : > { %2016 = vrot.lane.b32.xlu0 %v1985_v57, %s2089_s25 }
 0x4d0   : > { %1981 = vrot.lane.b32.xlu1 %v1975_v6, %s2089_s25 }
 0x4d1   : > { %2021 = vrot.lane.b32.xlu0 %v1985_v57, %s2090_s26 }
 0x4d4   : > { %2026 = vrot.lane.b32.xlu1 %v1975_v6, %s2090_s26 }
 0x527   : > { %v2434_v61 = vpop.permute.xlu0 %1986 }
 0x528   : > { %v2437_v62 = vunpack.i.l.bf16 %v2434_v61  ;;  %v1989_v37 = vunpack.i.h.bf16 %v2434_v61 }
 0x52a   : > { %v1440_v63 = vpack.c.bf16 %v2437_v62, %v2437_v62  ;;  %v1957_v2 = vpop.permute.xlu1 %1956 }
 0x52b   : > { %v2441_v0 = vpop.permute.xlu0 %1991  ;;  %v1959_v30 = vunpack.i.h.bf16 %v1957_v2  ;;  %v1958_v31 = vunpack.i.l.bf16 %v1957_v2 }
 0x52c   : > { %1501 = vrot.lane.b32.xlu0 %v1440_v63, %s2091_s27  ;;  %v1993_v9 = vunpack.i.l.bf16 %v2441_v0  ;;  %v1994_v41 = vunpack.i.h.bf16 %v2441_v0  ;;  %v1417_v0 = vsel %vm538_vm1, %v2437_v62, %v1989_v37 }
 0x52d   : > { %v1419_v5 = vsel %vm538_vm1, %v1958_v31, %v1959_v30  ;;  %v1418_v24 = vsel %vm538_vm1, %v1989_v37, %v1958_v31 }
 0x52e   : > { %v2444_v7 = vpop.permute.xlu1 %1961  ;;  %v1443_v42 = vpack.c.bf16 %v1419_v5, %v1419_v5  ;;  %v1442_v45 = vpack.c.bf16 %v1418_v24, %v1418_v24  ;;  %v1387_v54 = vsel %vm506_vm2, %v1993_v9, %v1994_v41 }
 0x52f   : > { %v2446_v8 = vpop.permute.xlu0 %1996  ;;  %v1964_v28 = vunpack.i.h.bf16 %v2444_v7  ;;  %v1963_v40 = vunpack.i.l.bf16 %v2444_v7 }
 0x530   : > { %v1998_v10 = vunpack.i.l.bf16 %v2446_v8  ;;  %v1999_v18 = vunpack.i.h.bf16 %v2446_v8 }
 0x531   : > { %v1389_v50 = vsel %vm506_vm2, %v1963_v40, %v1964_v28 }
 0x532   : > { %v1436_v11 = vpack.c.bf16 %v1998_v10, %v1993_v9  ;;  %v2450_v12 = vpop.permute.xlu1 %1966  ;;  %v1402_v49 = vsel %vm522_vm3, %v1998_v10, %v1999_v18 }
 0x533   : > { %v2452_v13 = vpop.permute.xlu0 %2001  ;;  %v1969_v1 = vunpack.i.h.bf16 %v2450_v12  ;;  %v1968_v14 = vunpack.i.l.bf16 %v2450_v12  ;;  %v1437_v55 = vpack.c.bf16 %v1402_v49, %v1387_v54 }
 0x534   : > { %1493 = vrot.lane.b32.xlu0 %v1436_v11, %s2091_s27  ;;  %v2003_v17 = vunpack.i.l.bf16 %v2452_v13  ;;  %v2004_v51 = vunpack.i.h.bf16 %v2452_v13  ;;  %v1441_v11 = vpack.c.bf16 %v1417_v0, %v1417_v0 }
 0x535   : > { %v1404_v46 = vsel %vm522_vm3, %v1968_v14, %v1969_v1 }
 0x536   : > { %v2455_v15 = vpop.permute.xlu1 %1355  ;;  %v1439_v52 = vpack.c.bf16 %v1404_v46, %v1389_v50  ;;  %v1357_v63 = vsel %vm474_vm5, %v2003_v17, %v2004_v51 }
 0x537   : > { %v2457_v16 = vpop.permute.xlu0 %2006 }
 0x538   : > { %v2008_v19 = vunpack.i.l.bf16 %v2457_v16  ;;  %v2009_v48 = vunpack.i.h.bf16 %v2457_v16  ;;  %v1403_v16 = vsel %vm522_vm3, %v1999_v18, %v1968_v14 }
 0x53a   : > { %v1432_v20 = vpack.c.bf16 %v2008_v19, %v2003_v17  ;;  %v2461_v21 = vpop.permute.xlu1 %1971  ;;  %v1372_v59 = vsel %vm490_vm4, %v2008_v19, %v2009_v48  ;;  %v1388_v19 = vsel %vm506_vm2, %v1994_v41, %v1963_v40 }
 0x53b   : > { %v2463_v22 = vpop.permute.xlu0 %2011  ;;  %v1974_v43 = vunpack.i.h.bf16 %v2461_v21  ;;  %v1973_v44 = vunpack.i.l.bf16 %v2461_v21  ;;  %v1433_v2 = vpack.c.bf16 %v1372_v59, %v1357_v63 }
 0x53c   : > { %1485 = vrot.lane.b32.xlu0 %v1432_v20, %s2091_s27  ;;  %v2013_v3 = vunpack.i.l.bf16 %v2463_v22  ;;  %v2014_v6 = vunpack.i.h.bf16 %v2463_v22  ;;  %v1438_v20 = vpack.c.bf16 %v1403_v16, %v1388_v19 }
 0x53d   : > { %v1374_v56 = vsel %vm490_vm4, %v1973_v44, %v1974_v43  ;;  %v1373_v22 = vsel %vm490_vm4, %v2009_v48, %v1973_v44 }
 0x53e   : > { %v2466_v23 = vpop.permute.xlu1 %1976  ;;  %v1435_v61 = vpack.c.bf16 %v1374_v56, %v2455_v15  ;;  %v1330_v12 = vsel %vm444_vm6, %v2013_v3, %v2014_v6 }
 0x53f   : > { %v2468_v25 = vpop.permute.xlu0 %2016  ;;  %v1979_v27 = vunpack.i.h.bf16 %v2466_v23  ;;  %v1978_v33 = vunpack.i.l.bf16 %v2466_v23 }
 0x540   : > { %v2018_v34 = vunpack.i.l.bf16 %v2468_v25  ;;  %v2019_v57 = vunpack.i.h.bf16 %v2468_v25 }
 0x541   : > { %v1329_v29 = vsel %vm444_vm6, %v1979_v27, %v2013_v3  ;;  %v1358_v27 = vsel %vm474_vm5, %v2004_v51, %v2455_v15  ;;  %v2073_v3 = vld [vmem:[#allocation2] sm:$0xff] }
 0x542   : > { %v2472_v32 = vpop.permute.xlu1 %1981  ;;  %v1345_v9 = vsel %vm460_vm7, %v2018_v34, %v2019_v57  ;;  %v1434_v30 = vpack.c.bf16 %v1373_v22, %v1358_v27 }
 0x543   : > { %v1984_v35 = vunpack.i.h.bf16 %v2472_v32  ;;  %v1983_v36 = vunpack.i.l.bf16 %v2472_v32  ;;  %v2022_v60 = vpop.permute.xlu0 %2021  ;;  %v1429_v13 = vpack.c.bf16 %v1345_v9, %v1330_v12 }
 0x544   : > { %v2024_v7 = vunpack.i.h.bf16 %v2022_v60  ;;  %v2023_v8 = vunpack.i.l.bf16 %v2022_v60 }
 0x545   : > { %v1431_v38 = vpack.c.bf16 %v1983_v36, %v1978_v33  ;;  %v1344_v39 = vsel %vm460_vm7, %v1984_v35, %v2018_v34  ;;  %v1346_v35 = vsel %vm460_vm7, %v2019_v57, %v1983_v36 }
 0x546   : > { %v1428_v26 = vpack.c.bf16 %v1344_v39, %v1329_v29  ;;  %v2027_v10 = vpop.permute.xlu1 %2026  ;;  %v1315_v62 = vsel %vm428_vm8, %v2023_v8, %v2024_v7 }
 0x547   : > { %1483 = vrot.lane.b32.xlu1 %v1431_v38, %s2091_s27  ;;  %v2029_v17 = vunpack.i.h.bf16 %v2027_v10  ;;  %v1425_v21 = vpack.c.bf16 %v1315_v62, %v2405_v47  ;;  %v2028_v31 = vunpack.i.l.bf16 %v2027_v10  ;;  %v1331_v47 = vsel %vm444_vm6, %v2014_v6, %v1978_v33 }
 0x548   : > { %1477 = vrot.lane.b32.xlu0 %v1428_v26, %s2091_s27  ;;  %v1430_v37 = vpack.c.bf16 %v1346_v35, %v1331_v47  ;;  %v2097_v38 = vmov 4  }
 0x549   : > { %v1314_v25 = vsel %vm428_vm8, %v2029_v17, %v2023_v8  ;;  %v1316_v15 = vsel %vm428_vm8, %v2024_v7, %v2028_v31  ;;  %2030 = vset.pattern.permute.xlu0 %v2097_v38  ;;  %v1427_v36 = vpack.c.bf16 %v2028_v31, %v2411_v58 }
 0x54a   : > { %v1424_v34 = vpack.c.bf16 %v1314_v25, %v2073_v3  ;;  %v1426_v32 = vpack.c.bf16 %v1316_v15, %v2407_v53 }
 0x54b   : > { %1507 = vrot.lane.b32.xlu1 %v1443_v42, %s2091_s27 }
 0x54c   : > { %1505 = vrot.lane.b32.xlu0 %v1442_v45, %s2091_s27 }
 0x54f   : > { %1499 = vrot.lane.b32.xlu1 %v1439_v52, %s2091_s27 }
 0x550   : > { %1495 = vrot.lane.b32.xlu0 %v1437_v55, %s2091_s27 }
 0x553   : > { %1491 = vrot.lane.b32.xlu1 %v1435_v61, %s2091_s27 }
 0x554   : > { %1487 = vrot.lane.b32.xlu0 %v1433_v2, %s2091_s27  ;;  %v1444_v2 = vld [vmem:[%s2583_s7] sm:$0xf] }
 0x557   : > { %1503 = vrot.lane.b32.xlu1 %v1441_v11, %s2091_s27 }
 0x558   : > { %1479 = vrot.lane.b32.xlu0 %v1429_v13, %s2091_s27 }
 0x55b   : > { %1497 = vrot.lane.b32.xlu1 %v1438_v20, %s2091_s27 }
 0x55c   : > { %1471 = vrot.lane.b32.xlu0 %v1425_v21, %s2091_s27 }
 0x55f   : > { %1489 = vrot.lane.b32.xlu1 %v1434_v30, %s2091_s27 }
 0x560   : > { %1469 = vrot.lane.b32.xlu0 %v1424_v34, %s2091_s27 }
 0x563   : > { %1481 = vrot.lane.b32.xlu1 %v1430_v37, %s2091_s27 }
 0x564   : > { %1446 = vperm.xlu0 %2030, %v2293_v4  }
 0x567   : > { %1473 = vrot.lane.b32.xlu1 %v1426_v32, %s2091_s27 }
 0x56b   : > { %1475 = vrot.lane.b32.xlu1 %v1427_v36, %s2091_s27 }
 0x59e   : > { %v1502_v23 = vpop.permute.xlu0 %1501 }
 0x5a6   : > { %v1494_v29 = vpop.permute.xlu0 %1493 }
 0x5ae   : > { %v1486_v33 = vpop.permute.xlu0 %1485 }
 0x5b9   : > { %v1484_v39 = vpop.permute.xlu1 %1483 }
 0x5ba   : > { %v1478_v1 = vpop.permute.xlu0 %1477 }
 0x5bd   : > { %v1508_v14 = vpop.permute.xlu1 %1507 }
 0x5be   : > { %v1506_v26 = vpop.permute.xlu0 %1505 }
 0x5bf   : > { %v1523_v5 = vsel %vm401_vm0, %v1506_v26, %v1508_v14 }
 0x5c0   : > { %v1546_v18 = vsel %vm664_vm10, %v1523_v5, 0 }
 0x5c1   : > { %v1500_v4 = vpop.permute.xlu1 %1499  ;;  %1851 = vmatpush3.bf16.msra.mxu1 %v1546_v18 }
 0x5c2   : > { %v1496_v53 = vpop.permute.xlu0 %1495  ;;  %1852 = vmatprep.subr.bf16.mxu1 %v2073_v3 }
 0x5c3   : > { %v1518_v48 = vsel %vm401_vm0, %v1494_v29, %v1496_v53 }
 0x5c5   : > { %v1492_v24 = vpop.permute.xlu1 %1491 }
 0x5c6   : > { %v1488_v28 = vpop.permute.xlu0 %1487 }
 0x5c7   : > { %v1515_v54 = vsel %vm401_vm0, %v1486_v33, %v1488_v28 }
 0x5c9   : > { %v1504_v58 = vpop.permute.xlu1 %1503 }
 0x5ca   : > { %v1521_v40 = vsel %vm401_vm0, %v1502_v23, %v1504_v58  ;;  %v1522_v41 = vsel %vm401_vm0, %v1504_v58, %v1506_v26  ;;  %v1480_v43 = vpop.permute.xlu0 %1479 }
 0x5cb   : > { %v1540_v42 = vsel %vm664_vm10, %v1521_v40, 0  ;;  %1764 = vmatprep.subr.msk.bf16.mxu0 %vm664_vm10, %v1522_v41  ;;  %v1512_v59 = vsel %vm401_vm0, %v1478_v1, %v1480_v43 }
 0x5cc   : > { %1555 = vmatpush1.bf16.msra.mxu0 %v1540_v42 }
 0x5cd   : > { %v1498_v44 = vpop.permute.xlu1 %1497 }
 0x5ce   : > { %v1520_v45 = vsel %vm401_vm0, %v1498_v44, %v1500_v4  ;;  %v1519_v46 = vsel %vm401_vm0, %v1496_v53, %v1498_v44  ;;  %v1472_v50 = vpop.permute.xlu0 %1471 }
 0x5cf   : > { %1556 = vmatprep.subr.bf16.mxu0 %v1519_v46  ;;  %1853 = vmatpush3.bf16.msra.mxu1 %v1520_v45 }
 0x5d0   : > { %1557 = vmatpush1.bf16.msra.mxu0 %v1518_v48  ;;  %1854 = vmatprep.subr.bf16.mxu1 %v2073_v3 }
 0x5d1   : > { %v1490_v49 = vpop.permute.xlu1 %1489 }
 0x5d2   : > { %v1517_v51 = vsel %vm401_vm0, %v1490_v49, %v1492_v24  ;;  %v1516_v52 = vsel %vm401_vm0, %v1488_v28, %v1490_v49  ;;  %v1470_v60 = vpop.permute.xlu0 %1469 }
 0x5d3   : > { %1558 = vmatprep.subr.bf16.mxu0 %v1516_v52  ;;  %1855 = vmatpush3.bf16.msra.mxu1 %v1517_v51  ;;  %v1509_v63 = vsel %vm401_vm0, %v1470_v60, %v1472_v50 }
 0x5d4   : > { %1559 = vmatpush1.bf16.msra.mxu0 %v1515_v54  ;;  %1856 = vmatprep.subr.bf16.mxu1 %v2073_v3 }
 0x5d5   : > { %v1482_v55 = vpop.permute.xlu1 %1481 }
 0x5d6   : > { %v1514_v56 = vsel %vm401_vm0, %v1482_v55, %v1484_v39  ;;  %v1513_v57 = vsel %vm401_vm0, %v1480_v43, %v1482_v55 }
 0x5d7   : > { %1560 = vmatprep.subr.bf16.mxu0 %v1513_v57  ;;  %1857 = vmatpush3.bf16.msra.mxu1 %v1514_v56 }
 0x5d8   : > { %1561 = vmatpush1.bf16.msra.mxu0 %v1512_v59  ;;  %1858 = vmatprep.subr.bf16.mxu1 %v2073_v3 }
 0x5d9   : > { %v1474_v6 = vpop.permute.xlu1 %1473 }
 0x5da   : > { %v1510_v61 = vsel %vm401_vm0, %v1472_v50, %v1474_v6 }
 0x5db   : > { %1562 = vmatprep.subr.bf16.mxu0 %v1510_v61 }
 0x5dc   : > { %1563 = vmatpush1.bf16.msra.mxu0 %v1509_v63 }
 0x5dd   : > { %v1476_v0 = vpop.permute.xlu1 %1475 }
 0x5de   : > { %v1511_v7 = vsel %vm401_vm0, %v1474_v6, %v1476_v0 }
 0x5df   : > { %1765 = vmatmul.mubr.msk.bf16.vlgmr.msra.gmra.mxu0 %vm660_vm11, %v1444_v2  ;;  %1859 = vmatpush3.bf16.msra.mxu1 %v1511_v7  ;;  %v1447_v8 = vpop.permute.xlu0 %1446 }
 0x5e2   : > { %1861 = vmatmul.mubr.msk.bf16.vlgmr.msra.gmra.mxu1 %vm660_vm11, %v1444_v2 }
 0x69f   : > { %v1582_v9 = vpop.f32.mrf.mxu0 }
 0x6a0   : > { %v1583_v10 = vadd.f32 %v1582_v9, %v1447_v8 }
 0x6a1   : > { %v1584_v11 = vpop.f32.mrf.mxu0 }
 0x6a2   : > { %v1767_v12 = vmul.f32 -1.442695, %v1583_v10  ;;  %v1585_v13 = vadd.f32 %v1584_v11, %v1447_v8  ;;  %v1623_v16 = vpop.f32.mrf.mxu1 }
 0x6a3   : > { %v1624_v17 = vadd.f32 %v1623_v16, %v1447_v8  ;;  %v1586_v62 = vpop.f32.mrf.mxu0 }
 0x6a4   : > { %2061 = vpow2.f32 %v1767_v12  ;;  %v1768_v19 = vmul.f32 -1.442695, %v1585_v13  ;;  %v1862_v20 = vpop.f32.mrf.mxu1 }
 0x6a5   : > { %v1769_v21 = vmul.f32 -1.442695, %v1624_v17  ;;  %v1587_v22 = vpop.f32.mrf.mxu0 }
 0x6a6   : > { %2063 = vpow2.f32 %v1768_v19  ;;  %v1626_v25 = vpop.f32.mrf.mxu1 }
 0x6a7   : > { %2065 = vpow2.f32 %v1769_v21 }
 0x6a8   : > { %v1863_v27 = vpop.f32.mrf.mxu1 }
 0x6b1   : > { %v2062_v30 = vpop.eup %2061 }
 0x6b2   : > { %v1638_v31 = vadd.f32 1.0, %v2062_v30 }
 0x6b3   : > { %v2064_v3 = vpop.eup %2063 }
 0x6b4   : > { %v2066_v34 = vpop.eup %2065  ;;  %2067 = vrcp.f32 %v1638_v31  ;;  %v1639_v35 = vadd.f32 1.0, %v2064_v3 }
 0x6b5   : > { %v1640_v47 = vadd.f32 1.0, %v2066_v34 }
 0x6b6   : > { %2069 = vrcp.f32 %v1639_v35 }
 0x6b7   : > { %2071 = vrcp.f32 %v1640_v47 }
 0x6c1   : > { %v2068_v37 = vpop.eup %2067 }
 0x6c2   : > { %v1647_v15 = vmul.f32 %v2068_v37, %v1583_v10 }
 0x6c3   : > { %v2070_v38 = vpop.eup %2069 }
 0x6c4   : > { %v2072_v32 = vpop.eup %2071  ;;  %1650 = vst [vmem:[%s396_s24] sm:$0xff] %v1647_v15  ;;  %v1648_v36 = vmul.f32 %v2070_v38, %v1585_v13 }
 0x6c5   : > { %v1649_v23 = vmul.f32 %v2072_v32, %v1624_v17 }
 0x6c6   : > { %1651 = vst [vmem:[%s396_s24 + $0x8] sm:$0xff] %v1648_v36 }
 0x6c7   : > { %1652 = vst [vmem:[%s396_s24 + $0x10] sm:$0xff] %v1649_v23 }
 0x6c8 PF: > { %s20_s13 = sadd.s32 1, %s2080_s13  }
 0x6c9   : > { %p17_p4 = scmp.ge.s32.totalorder %s20_s13, 4  }
 0x6cb   :  { %19 = sbr.rel (!%p17_p4) target bundleno = 1 (0x1), region = 96 }

</bundles_post_ra>
